<compile_context>
chip_gen: v5e
topology: v5e:2x2
jax: 0.10.0
libtpu: 0.0.40
codegen_flags: <defaults>
</compile_context>

<pallas_src>
import jax
import jax.numpy as jnp
from jax.experimental import pallas as pl
from jax.experimental.pallas import tpu as pltpu


def attn_classifier_kernel(x_ref, w1_ref, b1_ref, w2_ref, b2_ref,
                           wct_ref, bc_ref, emat_ref, logits_ref, attn_ref):
    # x_ref   : (TB, T*H) bf16  -- lane-dense batch tile
    # w1_ref  : (T*H, T*A) f32  -- block-diagonal Linear(H, A)
    # b1_ref  : (1, T*A)   f32  -- b1 tiled per timestep
    # w2_ref  : (T*A, T)   f32  -- block-diagonal Linear(A, 1)
    # b2_ref  : (1, 1)     f32  -- scalar bias in SMEM
    # wct_ref : (T*H, C)   f32  -- Wc tiled along T (fused pooling+classifier)
    # bc_ref  : (1, C)     f32
    # emat_ref: (T, T*H)   f32  -- 0/1 expansion matrix E[t, t*H + h] = 1
    xf = x_ref[...].astype(jnp.float32)                       # (TB, T*H) f32

    # ---- Attn.main layer 1 + ReLU: one lane-dense (TB,256)@(256,128) MXU matmul
    h = jnp.dot(xf, w1_ref[...],
                preferred_element_type=jnp.float32) + b1_ref[...]   # (TB, T*A)
    h = jnp.maximum(h, 0.0)

    # ---- Attn.main layer 2 (Linear(A,1) per timestep): second block-diagonal
    # matmul -> scores straight off the MXU, no lane-splitting.
    e = jnp.dot(h, w2_ref[...],
                preferred_element_type=jnp.float32) + b2_ref[0, 0]  # (TB, T)

    # ---- numerically-stable softmax over the T lanes (exact division) ----
    m = jnp.max(e, axis=-1, keepdims=True)                    # (TB, 1)
    p = jnp.exp(e - m)                                        # (TB, T)
    s = jnp.sum(p, axis=-1, keepdims=True)                    # (TB, 1)
    a = p / s                                                 # (TB, T)

    # ---- pooling fused with classifier head ----
    #   a_exp[b, t*H + h] = a[b, t]                  (MXU expansion matmul)
    #   logits[b, c] = sum_{t,h} a[b,t]*x[b,t,h]*Wc[h,c] + bc[c]
    a_exp = jnp.dot(a, emat_ref[...],
                    preferred_element_type=jnp.float32)       # (TB, T*H)
    weighted = xf * a_exp                                     # (TB, T*H)
    logits = jnp.dot(weighted, wct_ref[...],
                     preferred_element_type=jnp.float32) + bc_ref[...]   # (TB, C)

    logits_ref[...] = logits                                  # (TB, C)
    attn_ref[...] = a                                         # (TB, T)


def _block_diag(w, t):
    """(in, out) weight -> (t*in, t*out) block-diagonal matrix."""
    in_f, out_f = w.shape
    eye = jnp.eye(t, dtype=w.dtype)
    return (eye[:, None, :, None] * w[None, :, None, :]).reshape(t * in_f, t * out_f)


def attn_classifier(x, w1, b1, w2, b2, wc, bc, *, block_b=None):
    B, T, H = x.shape
    A = w1.shape[1]
    C = wc.shape[1]
    TH = T * H

    # ---- batch-tile heuristic (real lane-padded bytes: a bf16 lane-dense row
    # is T*H*2 bytes). Target ~1 MiB of streamed x per grid step, keep block_b
    # a multiple of 128 (lane-dense), and cap so a large batch still gets
    # >= 4 grid steps (>= 2 per TensorCore on v7x, pipeline overlap everywhere).
    if block_b is None:
        row_bytes = TH * 2
        block_b = (1 * 1024 * 1024) // max(row_bytes, 1)
        block_b = min(block_b, 1024)
        if B > 4 * 128:
            block_b = min(block_b, -(-B // 4))
        block_b = min(block_b, B)
    block_b = max(128, ((int(block_b) + 127) // 128) * 128)
    num_blocks = -(-B // block_b)
    B_pad = num_blocks * block_b

    # ---- lane-dense, bf16 x: (B, T, H) -> (B_pad, T*H) ----
    x_flat = x.reshape(B, TH).astype(jnp.bfloat16)
    if B_pad != B:
        x_flat = jnp.pad(x_flat, ((0, B_pad - B), (0, 0)))

    # ---- constant repacked weights (tiny, resident in VMEM across the grid) ----
    w1_bd = _block_diag(w1.astype(jnp.float32), T)            # (T*H, T*A)
    b1_t = jnp.tile(b1.astype(jnp.float32).reshape(1, A), (1, T))   # (1, T*A)
    w2_bd = _block_diag(w2.astype(jnp.float32), T)            # (T*A, T)
    b2_2d = b2.astype(jnp.float32).reshape(1, 1)              # scalar -> SMEM
    wc_t = jnp.tile(wc.astype(jnp.float32), (T, 1))           # (T*H, C)
    bc_2d = bc.astype(jnp.float32).reshape(1, C)
    e_mat = jnp.repeat(jnp.eye(T, dtype=jnp.float32), H, axis=1)    # (T, T*H)

    grid = (B_pad // block_b,)

    grid_spec = pltpu.PrefetchScalarGridSpec(
        num_scalar_prefetch=0,
        grid=grid,
        in_specs=[
            pl.BlockSpec((block_b, TH), lambda b: (b, 0)),        # x (bf16, lane-dense)
            pl.BlockSpec((TH, T * A), lambda b: (0, 0)),          # W1 block-diag
            pl.BlockSpec((1, T * A), lambda b: (0, 0)),           # b1 tiled
            pl.BlockSpec((T * A, T), lambda b: (0, 0)),           # W2 block-diag
            pl.BlockSpec(memory_space=pltpu.MemorySpace.SMEM),    # b2 scalar
            pl.BlockSpec((TH, C), lambda b: (0, 0)),              # Wc tiled along T
            pl.BlockSpec((1, C), lambda b: (0, 0)),               # bc
            pl.BlockSpec((T, TH), lambda b: (0, 0)),              # expansion matrix
        ],
        out_specs=[
            pl.BlockSpec((block_b, C), lambda b: (b, 0)),         # logits (B_pad, C)
            pl.BlockSpec((block_b, T), lambda b: (b, 0)),         # attns  (B_pad, T)
        ],
    )

    logits_p, attns_p = pl.pallas_call(
        attn_classifier_kernel,
        grid_spec=grid_spec,
        out_shape=(
            jax.ShapeDtypeStruct((B_pad, C), jnp.float32),
            jax.ShapeDtypeStruct((B_pad, T), jnp.float32),
        ),
        compiler_params=pltpu.CompilerParams(
            dimension_semantics=("parallel",),
            vmem_limit_bytes=32 * 1024 * 1024,   # ~5 MiB actual @ block_b=1024
        ),
    )(x_flat, w1_bd, b1_t, w2_bd, b2_2d, wc_t, bc_2d, e_mat)

    logits = logits_p[:B]
    attns = attns_p[:B][..., None]        # back to (B, T, 1) like the PyTorch module
    return logits, attns


def attn_classifier_ref(x, w1, b1, w2, b2, wc, bc):
    """Pure-JAX reference with identical semantics to the PyTorch module."""
    B, T, H = x.shape
    hp = jax.lax.Precision.HIGHEST
    tmp = x.reshape(-1, H)
    h = jax.nn.relu(jnp.dot(tmp, w1, precision=hp) + b1)
    e = (jnp.dot(h, w2, precision=hp) + b2).reshape(B, T)
    a = jax.nn.softmax(e, axis=1)[..., None]        # (B, T, 1)
    feats = (x * a).sum(axis=1)                     # (B, H)
    return jnp.dot(feats, wc, precision=hp) + bc, a


if __name__ == "__main__":
    T, H = 8, 32
    ATTN_NUM, C_NUM = 16, 4

    key = jax.random.PRNGKey(0)
    kx, k1, k2, k3, k4, k5, k6, kx2 = jax.random.split(key, 8)

    # Deterministic synthetic parameters ((in_features, out_features) layout).
    w1 = jax.random.normal(k1, (H, ATTN_NUM), dtype=jnp.float32) * 0.1
    b1 = jax.random.normal(k2, (ATTN_NUM,), dtype=jnp.float32) * 0.1
    w2 = jax.random.normal(k3, (ATTN_NUM, 1), dtype=jnp.float32) * 0.1
    b2 = jax.random.normal(k4, (1,), dtype=jnp.float32) * 0.1
    wc = jax.random.normal(k5, (H, C_NUM), dtype=jnp.float32) * 0.1
    bc = jax.random.normal(k6, (C_NUM,), dtype=jnp.float32) * 0.1

    # The kernel intentionally streams x in bf16 (memory-bound roofline win), so
    # the reference is evaluated on the bf16-rounded x; remaining differences
    # are only f32 matmul accumulation-order effects.
    TOL = dict(atol=1e-2, rtol=1e-2)

    # Case 1: small batch (B=2, padded up to one 128-row lane-dense block).
    B = 2
    x = jax.random.normal(kx, (B, T, H), dtype=jnp.float32)
    logits, attns = attn_classifier(x, w1, b1, w2, b2, wc, bc)
    jax.block_until_ready((logits, attns))
    x_q = x.astype(jnp.bfloat16).astype(jnp.float32)
    logits_ref, attns_ref = attn_classifier_ref(x_q, w1, b1, w2, b2, wc, bc)
    assert logits.shape == (B, C_NUM) and attns.shape == (B, T, 1)
    assert jnp.allclose(logits, logits_ref, **TOL)
    assert jnp.allclose(attns, attns_ref, **TOL)
    assert jnp.allclose(attns.sum(axis=1), 1.0, atol=1e-5)   # exact softmax division

    # Case 2: multi-step grid with batch padding (B=300, block_b=128 -> grid=(3,)).
    B2 = 300
    x2 = jax.random.normal(kx2, (B2, T, H), dtype=jnp.float32)
    logits2, attns2 = attn_classifier(x2, w1, b1, w2, b2, wc, bc, block_b=128)
    jax.block_until_ready((logits2, attns2))
    x2_q = x2.astype(jnp.bfloat16).astype(jnp.float32)
    logits2_ref, attns2_ref = attn_classifier_ref(x2_q, w1, b1, w2, b2, wc, bc)
    assert logits2.shape == (B2, C_NUM) and attns2.shape == (B2, T, 1)
    assert jnp.allclose(logits2, logits2_ref, **TOL)
    assert jnp.allclose(attns2, attns2_ref, **TOL)
    assert jnp.allclose(attns2.sum(axis=1), 1.0, atol=1e-5)

    print("KERNEL_OK")
</pallas_src>

<mosaic_0001>
module attributes {stable_mosaic.version = 11 : i64} {
  func.func @attn_classifier_kernel(%arg0: i32, %arg1: memref<128x256xbf16, #tpu.memory_space<vmem>>, %arg2: memref<256x128xf32, #tpu.memory_space<vmem>>, %arg3: memref<1x128xf32, #tpu.memory_space<vmem>>, %arg4: memref<128x8xf32, #tpu.memory_space<vmem>>, %arg5: memref<1x1xf32, #tpu.memory_space<smem>>, %arg6: memref<256x4xf32, #tpu.memory_space<vmem>>, %arg7: memref<1x4xf32, #tpu.memory_space<vmem>>, %arg8: memref<8x256xf32, #tpu.memory_space<vmem>>, %arg9: memref<128x4xf32, #tpu.memory_space<vmem>>, %arg10: memref<128x8xf32, #tpu.memory_space<vmem>>) attributes {dimension_semantics = [#tpu.dimension_semantics<parallel>], iteration_bounds = array<i64: 1>, scalar_prefetch = 0 : i64, scratch_operands = 0 : i64, tpu.core_type = #tpu.core_type<tc>, window_params = [{transform_indices = @transform_0, window_bounds = array<i64: 128, 256>}, {pipeline_mode = #tpu.pipeline_mode<synchronous>, transform_indices = @transform_1, window_bounds = array<i64: 256, 128>}, {pipeline_mode = #tpu.pipeline_mode<synchronous>, transform_indices = @transform_2, window_bounds = array<i64: 1, 128>}, {pipeline_mode = #tpu.pipeline_mode<synchronous>, transform_indices = @transform_3, window_bounds = array<i64: 128, 8>}, {transform_indices = @transform_4, window_bounds = array<i64: 1, 1>}, {pipeline_mode = #tpu.pipeline_mode<synchronous>, transform_indices = @transform_5, window_bounds = array<i64: 256, 4>}, {pipeline_mode = #tpu.pipeline_mode<synchronous>, transform_indices = @transform_6, window_bounds = array<i64: 1, 4>}, {pipeline_mode = #tpu.pipeline_mode<synchronous>, transform_indices = @transform_7, window_bounds = array<i64: 8, 256>}, {transform_indices = @transform_8, window_bounds = array<i64: 128, 4>}, {transform_indices = @transform_9, window_bounds = array<i64: 128, 8>}]} {
    %c0 = arith.constant 0 : index
    %c0_0 = arith.constant 0 : index
    %0 = vector.load %arg1[%c0, %c0_0] : memref<128x256xbf16, #tpu.memory_space<vmem>>, vector<128x256xbf16>
    %1 = arith.extf %0 : vector<128x256xbf16> to vector<128x256xf32>
    %c0_1 = arith.constant 0 : index
    %c0_2 = arith.constant 0 : index
    %2 = vector.load %arg2[%c0_1, %c0_2] : memref<256x128xf32, #tpu.memory_space<vmem>>, vector<256x128xf32>
    %cst = arith.constant dense<0.000000e+00> : vector<128x128xf32>
    %3 = tpu.matmul %1, %2, %cst {dimension_numbers = #tpu.dot_dimension_numbers<[1], [0], [0], [1], [0, 0, 1, 1], [], []>} : vector<128x256xf32>, vector<256x128xf32>, vector<128x128xf32> -> vector<128x128xf32>
    %c0_3 = arith.constant 0 : index
    %c0_4 = arith.constant 0 : index
    %4 = vector.load %arg3[%c0_3, %c0_4] : memref<1x128xf32, #tpu.memory_space<vmem>>, vector<1x128xf32>
    %5 = vector.broadcast %4 : vector<1x128xf32> to vector<128x128xf32>
    %6 = arith.addf %3, %5 : vector<128x128xf32>
    %cst_5 = arith.constant 0.000000e+00 : f32
    %7 = vector.broadcast %cst_5 : f32 to vector<128x128xf32>
    %8 = arith.maximumf %6, %7 : vector<128x128xf32>
    %c0_6 = arith.constant 0 : index
    %c0_7 = arith.constant 0 : index
    %9 = vector.load %arg4[%c0_6, %c0_7] : memref<128x8xf32, #tpu.memory_space<vmem>>, vector<128x8xf32>
    %cst_8 = arith.constant dense<0.000000e+00> : vector<128x8xf32>
    %10 = tpu.matmul %8, %9, %cst_8 {dimension_numbers = #tpu.dot_dimension_numbers<[1], [0], [0], [1], [0, 0, 1, 1], [], []>} : vector<128x128xf32>, vector<128x8xf32>, vector<128x8xf32> -> vector<128x8xf32>
    %c0_9 = arith.constant 0 : index
    %c0_10 = arith.constant 0 : index
    %11 = memref.load %arg5[%c0_9, %c0_10] : memref<1x1xf32, #tpu.memory_space<smem>>
    %12 = vector.broadcast %11 : f32 to vector<128x8xf32>
    %13 = arith.addf %10, %12 : vector<128x8xf32>
    %cst_11 = arith.constant dense<0xFF800000> : vector<128xf32>
    %14 = vector.multi_reduction <maximumf>, %13, %cst_11 [1] : vector<128x8xf32> to vector<128xf32>
    %15 = vector.shape_cast %14 : vector<128xf32> to vector<128x1xf32>
    %16 = vector.broadcast %15 : vector<128x1xf32> to vector<128x8xf32>
    %17 = arith.subf %13, %16 : vector<128x8xf32>
    %18 = math.exp %17 : vector<128x8xf32>
    %cst_12 = arith.constant dense<0.000000e+00> : vector<128xf32>
    %19 = vector.multi_reduction <add>, %18, %cst_12 [1] : vector<128x8xf32> to vector<128xf32>
    %20 = vector.shape_cast %19 : vector<128xf32> to vector<128x1xf32>
    %21 = vector.broadcast %20 : vector<128x1xf32> to vector<128x8xf32>
    %22 = arith.divf %18, %21 : vector<128x8xf32>
    %c0_13 = arith.constant 0 : index
    %c0_14 = arith.constant 0 : index
    %23 = vector.load %arg8[%c0_13, %c0_14] : memref<8x256xf32, #tpu.memory_space<vmem>>, vector<8x256xf32>
    %cst_15 = arith.constant dense<0.000000e+00> : vector<128x256xf32>
    %24 = tpu.matmul %22, %23, %cst_15 {dimension_numbers = #tpu.dot_dimension_numbers<[1], [0], [0], [1], [0, 0, 1, 1], [], []>} : vector<128x8xf32>, vector<8x256xf32>, vector<128x256xf32> -> vector<128x256xf32>
    %25 = arith.mulf %1, %24 : vector<128x256xf32>
    %c0_16 = arith.constant 0 : index
    %c0_17 = arith.constant 0 : index
    %26 = vector.load %arg6[%c0_16, %c0_17] : memref<256x4xf32, #tpu.memory_space<vmem>>, vector<256x4xf32>
    %cst_18 = arith.constant dense<0.000000e+00> : vector<128x4xf32>
    %27 = tpu.matmul %25, %26, %cst_18 {dimension_numbers = #tpu.dot_dimension_numbers<[1], [0], [0], [1], [0, 0, 1, 1], [], []>} : vector<128x256xf32>, vector<256x4xf32>, vector<128x4xf32> -> vector<128x4xf32>
    %c0_19 = arith.constant 0 : index
    %c0_20 = arith.constant 0 : index
    %28 = vector.load %arg7[%c0_19, %c0_20] : memref<1x4xf32, #tpu.memory_space<vmem>>, vector<1x4xf32>
    %29 = vector.broadcast %28 : vector<1x4xf32> to vector<128x4xf32>
    %30 = arith.addf %27, %29 : vector<128x4xf32>
    %c0_21 = arith.constant 0 : index
    %c0_22 = arith.constant 0 : index
    %31 = vector.load %arg9[%c0_21, %c0_22] : memref<128x4xf32, #tpu.memory_space<vmem>>, vector<128x4xf32>
    tpu.vector_store %arg9[%c0_21, %c0_22], %30 {strides = array<i32>} : memref<128x4xf32, #tpu.memory_space<vmem>>, vector<128x4xf32>,
    %c0_23 = arith.constant 0 : index
    %c0_24 = arith.constant 0 : index
    %32 = vector.load %arg10[%c0_23, %c0_24] : memref<128x8xf32, #tpu.memory_space<vmem>>, vector<128x8xf32>
    tpu.vector_store %arg10[%c0_23, %c0_24], %22 {strides = array<i32>} : memref<128x8xf32, #tpu.memory_space<vmem>>, vector<128x8xf32>,
    return
  }
  func.func @transform_0(%arg0: i32) -> (i32, i32) {
    %c0_i32 = arith.constant 0 : i32
    %c0_i32_0 = arith.constant 0 : i32
    return %arg0, %c0_i32 : i32, i32
  }
  func.func @transform_1(%arg0: i32) -> (i32, i32) {
    %c0_i32 = arith.constant 0 : i32
    %c0_i32_0 = arith.constant 0 : i32
    %c0_i32_1 = arith.constant 0 : i32
    return %c0_i32, %c0_i32_0 : i32, i32
  }
  func.func @transform_2(%arg0: i32) -> (i32, i32) {
    %c0_i32 = arith.constant 0 : i32
    %c0_i32_0 = arith.constant 0 : i32
    %c0_i32_1 = arith.constant 0 : i32
    return %c0_i32, %c0_i32_0 : i32, i32
  }
  func.func @transform_3(%arg0: i32) -> (i32, i32) {
    %c0_i32 = arith.constant 0 : i32
    %c0_i32_0 = arith.constant 0 : i32
    %c0_i32_1 = arith.constant 0 : i32
    return %c0_i32, %c0_i32_0 : i32, i32
  }
  func.func @transform_4(%arg0: i32) -> (i32, i32) {
    %c0_i32 = arith.constant 0 : i32
    %c0_i32_0 = arith.constant 0 : i32
    %c0_i32_1 = arith.constant 0 : i32
    return %c0_i32, %c0_i32_0 : i32, i32
  }
  func.func @transform_5(%arg0: i32) -> (i32, i32) {
    %c0_i32 = arith.constant 0 : i32
    %c0_i32_0 = arith.constant 0 : i32
    %c0_i32_1 = arith.constant 0 : i32
    return %c0_i32, %c0_i32_0 : i32, i32
  }
  func.func @transform_6(%arg0: i32) -> (i32, i32) {
    %c0_i32 = arith.constant 0 : i32
    %c0_i32_0 = arith.constant 0 : i32
    %c0_i32_1 = arith.constant 0 : i32
    return %c0_i32, %c0_i32_0 : i32, i32
  }
  func.func @transform_7(%arg0: i32) -> (i32, i32) {
    %c0_i32 = arith.constant 0 : i32
    %c0_i32_0 = arith.constant 0 : i32
    %c0_i32_1 = arith.constant 0 : i32
    return %c0_i32, %c0_i32_0 : i32, i32
  }
  func.func @transform_8(%arg0: i32) -> (i32, i32) {
    %c0_i32 = arith.constant 0 : i32
    %c0_i32_0 = arith.constant 0 : i32
    return %arg0, %c0_i32 : i32, i32
  }
  func.func @transform_9(%arg0: i32) -> (i32, i32) {
    %c0_i32 = arith.constant 0 : i32
    %c0_i32_0 = arith.constant 0 : i32
    return %arg0, %c0_i32 : i32, i32
  }
}

</mosaic_0001>

<bundles_post_ra>
// kernel: tpu_custom_call.1
= control target key start
LH: loop header
LB: loop body
LE: loop exit
PB: predicated region body
PF: predicated region fallthrough
CT: control target
= control target key end

     0   :  { %16 = vsyncpa [#allocation4], 0  ;;  %s1322_s12 = smov [#allocation3]   ;;  %s2394_s0 = inlined_call_operand.vmem [shape: bf16[128,256], index: 0, kind: input, shape index: {}]   ;;  %s2395_s1 = inlined_call_operand.vmem [shape: f32[256,128], index: 1, kind: input, shape index: {}]   ;;  %s2396_s2 = inlined_call_operand.vmem [shape: f32[1,128], index: 2, kind: input, shape index: {}]   ;;  %s2397_s3 = inlined_call_operand.vmem [shape: f32[128,8], index: 3, kind: input, shape index: {}]   ;;  %s2398_s4 = inlined_call_operand.<no memory space> [shape: f32[1,1], index: 4, kind: input, shape index: {}]   ;;  %s2399_s5 = inlined_call_operand.vmem [shape: f32[256,4], index: 5, kind: input, shape index: {}]   ;;  %s2400_s6 = inlined_call_operand.vmem [shape: f32[1,4], index: 6, kind: input, shape index: {}]   ;;  %s2401_s7 = inlined_call_operand.hbm [shape: f32[8,256], index: 7, kind: input, shape index: {}]   ;;  %s2402_s8 = inlined_call_operand.vmem [shape: f32[128,4], index: 8, kind: output, shape index: {0}]   ;;  %s2403_s9 = inlined_call_operand.vmem [shape: f32[128,8], index: 9, kind: output, shape index: {1}]  }
   0x1   :  { %s36_s11 = sshll.u32 %s2401_s7, 4  ;;  %s38_s13 = sshll.u32 %s1322_s12, 4  ;;  %s37_s11 = int_to_ptr.hbm [resolvable:$true] %s36_s11  ;;  %s39_s13 = int_to_ptr.vmem [resolvable:$true] %s38_s13 }
   0x2   :  { %41 = dma.hbm_to_vmem [thread:$0]  %s37_s11, 256, %s39_s13, [#allocation4]  }
   0x3   :  { %1320 = dma.done.wait [#allocation4], 256  }
   0x4   :  { %1321 = vsyncadd [#allocation4], 4294967040  ;;  %v109_v0 = vld [vmem:[%s2395_s1 + $0x78] sm:$0xff]  ;;  %v108_v1 = vld [vmem:[%s2395_s1 + $0x70] sm:$0xff]  ;;  %vm359_vm0 = vcmask 64512  }
   0x5   :  { %v1385_v2 = vld [vmem:[%s2395_s1 + $0xf8] sm:$0xff]  ;;  %130 = vmatpush.msra.mxu0 %v109_v0  ;;  %v1391_v3 = vld [vmem:[%s2395_s1 + $0xf0] sm:$0xff]  ;;  %v107_v4 = vld [vmem:[%s2395_s1 + $0x68] sm:$0xff]  ;;  %1196 = vmatpush.msra.mxu2 %v109_v0 }
   0x6   :  { %195 = vmatpush.msra.mxu1 %v1385_v2  ;;  %v1399_v5 = vld [vmem:[%s2395_s1 + $0xe8] sm:$0xff]  ;;  %v106_v6 = vld [vmem:[%s2395_s1 + $0x60] sm:$0xff]  ;;  %v105_v8 = vld [vmem:[%s2395_s1 + $0x58] sm:$0xff] }
   0x7   :  { %131 = vmatpush.msra.mxu0 %v108_v1  ;;  %v1408_v7 = vld [vmem:[%s2395_s1 + $0xe0] sm:$0xff]  ;;  %1197 = vmatpush.msra.mxu2 %v108_v1  ;;  %v1417_v9 = vld [vmem:[%s2395_s1 + $0xd8] sm:$0xff]  ;;  %v104_v10 = vld [vmem:[%s2395_s1 + $0x50] sm:$0xff] }
   0x8   :  { %196 = vmatpush.msra.mxu1 %v1391_v3  ;;  %v1426_v11 = vld [vmem:[%s2395_s1 + $0xd0] sm:$0xff]  ;;  %v103_v12 = vld [vmem:[%s2395_s1 + $0x48] sm:$0xff]  ;;  %v102_v14 = vld [vmem:[%s2395_s1 + $0x40] sm:$0xff] }
   0x9   :  { %132 = vmatpush.msra.mxu0 %v107_v4  ;;  %1198 = vmatpush.msra.mxu2 %v107_v4  ;;  %v1435_v13 = vld [vmem:[%s2395_s1 + $0xc8] sm:$0xff]  ;;  %v1444_v15 = vld [vmem:[%s2395_s1 + $0xc0] sm:$0xff]  ;;  %v101_v16 = vld [vmem:[%s2395_s1 + $0x38] sm:$0xff] }
   0xa   :  { %197 = vmatpush.msra.mxu1 %v1399_v5  ;;  %v1453_v17 = vld [vmem:[%s2395_s1 + $0xb8] sm:$0xff]  ;;  %v100_v18 = vld [vmem:[%s2395_s1 + $0x30] sm:$0xff]  ;;  %v99_v20 = vld [vmem:[%s2395_s1 + $0x28] sm:$0xff] }
   0xb   :  { %133 = vmatpush.msra.mxu0 %v106_v6  ;;  %1199 = vmatpush.msra.mxu2 %v106_v6  ;;  %v1462_v19 = vld [vmem:[%s2395_s1 + $0xb0] sm:$0xff]  ;;  %v1471_v21 = vld [vmem:[%s2395_s1 + $0xa8] sm:$0xff]  ;;  %v98_v22 = vld [vmem:[%s2395_s1 + $0x20] sm:$0xff] }
   0xc   :  { %198 = vmatpush.msra.mxu1 %v1408_v7  ;;  %v1480_v23 = vld [vmem:[%s2395_s1 + $0xa0] sm:$0xff]  ;;  %v97_v24 = vld [vmem:[%s2395_s1 + $0x18] sm:$0xff]  ;;  %v96_v26 = vld [vmem:[%s2395_s1 + $0x10] sm:$0xff] }
   0xd   :  { %134 = vmatpush.msra.mxu0 %v105_v8  ;;  %1200 = vmatpush.msra.mxu2 %v105_v8  ;;  %v1489_v25 = vld [vmem:[%s2395_s1 + $0x98] sm:$0xff]  ;;  %v1498_v27 = vld [vmem:[%s2395_s1 + $0x90] sm:$0xff]  ;;  %v1504_v28 = vld [vmem:[%s2394_s0] sm:$0xff] }
   0xe   :  { %199 = vmatpush.msra.mxu1 %v1417_v9  ;;  %v95_v29 = vld [vmem:[%s2395_s1 + $0x8] sm:$0xff]  ;;  %v1516_v31 = vld [vmem:[%s2394_s0 + $0x58] sm:$0xff]  ;;  %v94_v32 = vld [vmem:[%s2395_s1] sm:$0xff]  ;;  %v62_v33 = vunpack.c.l.bf16 %v1504_v28  ;;  %v63_v35 = vunpack.c.h.bf16 %v1504_v28 }
   0xf   :  { %135 = vmatpush.msra.mxu0 %v104_v10  ;;  %1201 = vmatpush.msra.mxu2 %v104_v10  ;;  %v111_v30 = vld [vmem:[%s2395_s1 + $0x88] sm:$0xff]  ;;  %v110_v34 = vld [vmem:[%s2395_s1 + $0x80] sm:$0xff]  ;;  %v2413_v36 = vunpack.c.l.bf16 %v1516_v31  ;;  %v1556_v42 = vld [vmem:[%s2394_s0 + $0x10] sm:$0xff]  ;;  %v2412_v60 = vunpack.c.h.bf16 %v1516_v31 }
  0x10   :  { %200 = vmatpush.msra.mxu1 %v1426_v11  ;;  %v1534_v37 = vld [vmem:[%s2394_s0 + $0x8] sm:$0xff]  ;;  %v1541_v38 = vld [vmem:[%s2394_s0 + $0x60] sm:$0xff]  ;;  %v66_v44 = vunpack.c.l.bf16 %v1556_v42  ;;  %v67_v45 = vunpack.c.h.bf16 %v1556_v42  ;;  %v1579_v47 = vld [vmem:[%s2394_s0 + $0x18] sm:$0xff] }
  0x11   :  { %136 = vmatpush.msra.mxu0 %v103_v12  ;;  %1202 = vmatpush.msra.mxu2 %v103_v12  ;;  %v64_v39 = vunpack.c.l.bf16 %v1534_v37  ;;  %v65_v40 = vunpack.c.h.bf16 %v1534_v37  ;;  %v2411_v41 = vunpack.c.l.bf16 %v1541_v38  ;;  %v1564_v43 = vld [vmem:[%s2394_s0 + $0x68] sm:$0xff]  ;;  %v1587_v48 = vld [vmem:[%s2394_s0 + $0x70] sm:$0xff]  ;;  %v68_v49 = vunpack.c.l.bf16 %v1579_v47  ;;  %v1602_v52 = vld [vmem:[%s2394_s0 + $0x20] sm:$0xff] }
  0x12   :  { %201 = vmatpush.msra.mxu1 %v1435_v13  ;;  %v2409_v46 = vunpack.c.l.bf16 %v1564_v43  ;;  %v69_v50 = vunpack.c.h.bf16 %v1579_v47  ;;  %v2407_v51 = vunpack.c.l.bf16 %v1587_v48  ;;  %v1610_v53 = vld [vmem:[%s2394_s0 + $0x78] sm:$0xff]  ;;  %v70_v54 = vunpack.c.l.bf16 %v1602_v52  ;;  %v1624_v57 = vld [vmem:[%s2394_s0 + $0x28] sm:$0xff]  ;;  %v1638_v61 = vld [vmem:[%s2394_s0 + $0x30] sm:$0xff] }
  0x13   :  { %137 = vmatpush.msra.mxu0 %v102_v14  ;;  %1203 = vmatpush.msra.mxu2 %v102_v14  ;;  %v71_v55 = vunpack.c.h.bf16 %v1602_v52  ;;  %v2405_v56 = vunpack.c.l.bf16 %v1610_v53  ;;  %v72_v58 = vunpack.c.l.bf16 %v1624_v57  ;;  %v73_v59 = vunpack.c.h.bf16 %v1624_v57  ;;  %v291_v1 = vld [vmem:[%s2397_s3 + $0x78] sm:$0xff]  ;;  %v289_v4 = vld [vmem:[%s2397_s3 + $0x68] sm:$0xff]  ;;  %v286_v10 = vld [vmem:[%s2397_s3 + $0x50] sm:$0xff] }
  0x14   :  { %202 = vmatpush.msra.mxu1 %v1444_v15  ;;  %v74_v62 = vunpack.c.l.bf16 %v1638_v61  ;;  %v2422_v63 = vunpack.c.h.bf16 %v1638_v61  ;;  %v2410_v0 = vunpack.c.h.bf16 %v1541_v38  ;;  %v2408_v8 = vunpack.c.h.bf16 %v1564_v43  ;;  %v285_v12 = vld [vmem:[%s2397_s3 + $0x48] sm:$0xff] }
  0x15   :  { %138 = vmatpush.msra.mxu0 %v101_v16  ;;  %1204 = vmatpush.msra.mxu2 %v101_v16  ;;  %v2406_v16 = vunpack.c.h.bf16 %v1587_v48  ;;  %v2423_v52 = vunpack.c.h.bf16 %v1638_v61 }
  0x16   :  { %203 = vmatpush.msra.mxu1 %v1453_v17 }
  0x17   :  { %139 = vmatpush.msra.mxu0 %v100_v18  ;;  %1205 = vmatpush.msra.mxu2 %v100_v18  ;;  %v282_v18 = vld [vmem:[%s2397_s3 + $0x30] sm:$0xff] }
  0x18   :  { %204 = vmatpush.msra.mxu1 %v1462_v19 }
  0x19   :  { %140 = vmatpush.msra.mxu0 %v99_v20  ;;  %1206 = vmatpush.msra.mxu2 %v99_v20  ;;  %v281_v20 = vld [vmem:[%s2397_s3 + $0x28] sm:$0xff] }
  0x1a   :  { %205 = vmatpush.msra.mxu1 %v1471_v21 }
  0x1b   :  { %141 = vmatpush.msra.mxu0 %v98_v22  ;;  %1207 = vmatpush.msra.mxu2 %v98_v22 }
  0x1c   :  { %206 = vmatpush.msra.mxu1 %v1480_v23 }
  0x1d   :  { %142 = vmatpush.msra.mxu0 %v97_v24  ;;  %1208 = vmatpush.msra.mxu2 %v97_v24  ;;  %v2404_v24 = vunpack.c.h.bf16 %v1610_v53 }
  0x1e   :  { %207 = vmatpush.msra.mxu1 %v1489_v25 }
  0x1f   :  { %143 = vmatpush.msra.mxu0 %v96_v26  ;;  %1209 = vmatpush.msra.mxu2 %v96_v26  ;;  %v1733_v26 = vld [vmem:[%s2394_s0 + $0x50] sm:$0xff] }
  0x20   :  { %208 = vmatpush.msra.mxu1 %v1498_v27 }
  0x21   :  { %144 = vmatpush.msra.mxu0 %v95_v29  ;;  %1210 = vmatpush.msra.mxu2 %v95_v29  ;;  %v2414_v29 = vunpack.c.h.bf16 %v1733_v26 }
  0x22   :  { %209 = vmatpush.msra.mxu1 %v111_v30 }
  0x23   :  { %145 = vmatpush.msra.mxu0 %v94_v32  ;;  %1211 = vmatpush.msra.mxu2 %v94_v32  ;;  %v277_v32 = vld [vmem:[%s2397_s3 + $0x8] sm:$0xff] }
  0x24   :  { %210 = vmatpush.msra.mxu1 %v110_v34  ;;  %146 = vmatmul.f32.vlgmr.msra.gmra.mxu0 %v62_v33 }
  0x25   :  { %211 = vmatmul.f32.vlgmr.msra.gmra.mxu1 %v63_v35  ;;  %179 = vmatmul.f32.vlgmr.msra.gmra.mxu2 %v2413_v36 }
  0x26   :  { %1212 = vmatpush.msrb.mxu2 %v1385_v2  ;;  %v290_v2 = vld [vmem:[%s2397_s3 + $0x70] sm:$0xff] }
  0x28   :  { %1213 = vmatpush.msrb.mxu2 %v1391_v3  ;;  %v1658_v3 = vld [vmem:[%s2394_s0 + $0x38] sm:$0xff] }
  0x29   :  { %v2420_v6 = vunpack.c.h.bf16 %v1658_v3  ;;  %v2425_v57 = vunpack.c.h.bf16 %v1658_v3 }
  0x2a   :  { %1214 = vmatpush.msrb.mxu2 %v1399_v5  ;;  %v2421_v5 = vunpack.c.l.bf16 %v1658_v3 }
  0x2c   :  { %149 = vmatmul.f32.gmra.mxu0 %v64_v39  ;;  %1215 = vmatpush.msrb.mxu2 %v1408_v7  ;;  %v288_v7 = vld [vmem:[%s2397_s3 + $0x60] sm:$0xff] }
  0x2d   :  { %214 = vmatmul.f32.gmra.mxu1 %v65_v40  ;;  %182 = vmatmul.f32.gmra.mxu2 %v2411_v41 }
  0x2e   :  { %1216 = vmatpush.msrb.mxu2 %v1417_v9  ;;  %v287_v9 = vld [vmem:[%s2397_s3 + $0x58] sm:$0xff] }
  0x30   :  { %1217 = vmatpush.msrb.mxu2 %v1426_v11  ;;  %v1684_v11 = vld [vmem:[%s2394_s0 + $0x40] sm:$0xff] }
  0x31   :  { %v2418_v14 = vunpack.c.h.bf16 %v1684_v11  ;;  %v2427_v61 = vunpack.c.h.bf16 %v1684_v11 }
  0x32   :  { %1218 = vmatpush.msrb.mxu2 %v1435_v13  ;;  %v2419_v13 = vunpack.c.l.bf16 %v1684_v11 }
  0x34   :  { %152 = vmatmul.f32.gmra.mxu0 %v66_v44  ;;  %1219 = vmatpush.msrb.mxu2 %v1444_v15  ;;  %v284_v15 = vld [vmem:[%s2397_s3 + $0x40] sm:$0xff] }
  0x35   :  { %217 = vmatmul.f32.gmra.mxu1 %v67_v45  ;;  %185 = vmatmul.f32.gmra.mxu2 %v2409_v46 }
  0x36   :  { %1220 = vmatpush.msrb.mxu2 %v1453_v17  ;;  %v283_v17 = vld [vmem:[%s2397_s3 + $0x38] sm:$0xff] }
  0x38   :  { %1221 = vmatpush.msrb.mxu2 %v1462_v19  ;;  %v1710_v19 = vld [vmem:[%s2394_s0 + $0x48] sm:$0xff] }
  0x39   :  { %v2416_v22 = vunpack.c.h.bf16 %v1710_v19 }
  0x3a   :  { %1222 = vmatpush.msrb.mxu2 %v1471_v21  ;;  %v2417_v21 = vunpack.c.l.bf16 %v1710_v19 }
  0x3c   :  { %155 = vmatmul.f32.gmra.mxu0 %v68_v49  ;;  %1223 = vmatpush.msrb.mxu2 %v1480_v23  ;;  %v280_v23 = vld [vmem:[%s2397_s3 + $0x20] sm:$0xff] }
  0x3d   :  { %220 = vmatmul.f32.gmra.mxu1 %v69_v50  ;;  %188 = vmatmul.f32.gmra.mxu2 %v2407_v51 }
  0x3e   :  { %1224 = vmatpush.msrb.mxu2 %v1489_v25  ;;  %v279_v25 = vld [vmem:[%s2397_s3 + $0x18] sm:$0xff] }
  0x40   :  { %1225 = vmatpush.msrb.mxu2 %v1498_v27  ;;  %v2415_v27 = vunpack.c.l.bf16 %v1733_v26 }
  0x42   :  { %1226 = vmatpush.msrb.mxu2 %v111_v30  ;;  %v278_v30 = vld [vmem:[%s2397_s3 + $0x10] sm:$0xff] }
  0x44   :  { %158 = vmatmul.f32.gmra.mxu0 %v70_v54  ;;  %1227 = vmatpush.msrb.mxu2 %v110_v34  ;;  %v276_v34 = vld [vmem:[%s2397_s3] sm:$0xff] }
  0x45   :  { %223 = vmatmul.f32.gmra.mxu1 %v71_v55  ;;  %191 = vmatmul.f32.gmra.mxu2 %v2405_v56 }
  0x46   :  { %294 = vmatpush.msra.mxu2 %v291_v1  ;;  %v1755_v1 = vld [vmem:[%s2396_s2] ss:$0 sm:$0xff] }
  0x48   :  { %295 = vmatpush.msra.mxu2 %v290_v2 }
  0x4a   :  { %296 = vmatpush.msra.mxu2 %v289_v4 }
  0x4c   :  { %161 = vmatmul.f32.gmra.mxu0 %v72_v58  ;;  %297 = vmatpush.msra.mxu2 %v288_v7 }
  0x4d   :  { %226 = vmatmul.f32.gmra.mxu1 %v73_v59  ;;  %244 = vmatmul.f32.vlgmr.msrb.gmra.mxu2 %v2412_v60 }
  0x4e   :  { %298 = vmatpush.msra.mxu2 %v287_v9 }
  0x50   :  { %299 = vmatpush.msra.mxu2 %v286_v10 }
  0x52   :  { %300 = vmatpush.msra.mxu2 %v285_v12 }
  0x54   :  { %164 = vmatmul.f32.gmra.mxu0 %v74_v62  ;;  %301 = vmatpush.msra.mxu2 %v284_v15 }
  0x55   :  { %229 = vmatmul.f32.gmra.mxu1 %v2422_v63  ;;  %247 = vmatmul.f32.gmra.mxu2 %v2410_v0 }
  0x56   :  { %302 = vmatpush.msra.mxu2 %v283_v17 }
  0x58   :  { %303 = vmatpush.msra.mxu2 %v282_v18 }
  0x5a   :  { %304 = vmatpush.msra.mxu2 %v281_v20 }
  0x5c   :  { %167 = vmatmul.f32.gmra.mxu0 %v2421_v5  ;;  %305 = vmatpush.msra.mxu2 %v280_v23 }
  0x5d   :  { %232 = vmatmul.f32.gmra.mxu1 %v2420_v6  ;;  %250 = vmatmul.f32.gmra.mxu2 %v2408_v8 }
  0x5e   :  { %306 = vmatpush.msra.mxu2 %v279_v25 }
  0x60   :  { %307 = vmatpush.msra.mxu2 %v278_v30 }
  0x62   :  { %308 = vmatpush.msra.mxu2 %v277_v32 }
  0x64   :  { %170 = vmatmul.f32.gmra.mxu0 %v2419_v13  ;;  %309 = vmatpush.msra.mxu2 %v276_v34 }
  0x65   :  { %235 = vmatmul.f32.gmra.mxu1 %v2418_v14  ;;  %253 = vmatmul.f32.gmra.mxu2 %v2406_v16 }
  0x6c   :  { %173 = vmatmul.f32.gmra.mxu0 %v2417_v21 }
  0x6d   :  { %238 = vmatmul.f32.gmra.mxu1 %v2416_v22  ;;  %256 = vmatmul.f32.gmra.mxu2 %v2404_v24 }
  0x74   :  { %176 = vmatmul.f32.gmra.mxu0 %v2415_v27 }
  0x75   :  { %241 = vmatmul.f32.gmra.mxu1 %v2414_v29 }
  0xa1   :  { %v147_v2 = vpop.f32.mrf.mxu0 }
  0xa2   :  { %v212_v4 = vpop.f32.mrf.mxu1  ;;  %v148_v7 = vadd.f32 %v1755_v1, %v147_v2 }
  0xa4   :  { %v213_v9 = vadd.f32 %v212_v4, %v148_v7 }
  0xa6   :  { %v260_v10 = vmax.f32 %v213_v9, 0.0 }
  0xa8   :  { %310 = vmatmul.f32.vlgmr.msra.gmra.mxu2 %v260_v10  ;;  %v180_v4 = vpop.f32.mrf.mxu2 }
  0xa9   :  { %v150_v12 = vpop.f32.mrf.mxu0 }
  0xaa   :  { %v215_v15 = vpop.f32.mrf.mxu1  ;;  %v151_v17 = vadd.f32 %v1755_v1, %v150_v12 }
  0xac   :  { %v216_v18 = vadd.f32 %v215_v15, %v151_v17 }
  0xae   :  { %v261_v20 = vmax.f32 %v216_v18, 0.0 }
  0xb0   :  { %313 = vmatmul.f32.gmra.mxu2 %v261_v20  ;;  %v183_v18 = vpop.f32.mrf.mxu2 }
  0xb1   :  { %v153_v23 = vpop.f32.mrf.mxu0 }
  0xb2   :  { %v218_v25 = vpop.f32.mrf.mxu1  ;;  %v154_v30 = vadd.f32 %v1755_v1, %v153_v23 }
  0xb4   :  { %v219_v32 = vadd.f32 %v218_v25, %v154_v30 }
  0xb6   :  { %v262_v34 = vmax.f32 %v219_v32, 0.0 }
  0xb8   :  { %316 = vmatmul.f32.gmra.mxu2 %v262_v34  ;;  %v186_v16 = vpop.f32.mrf.mxu2 }
  0xb9   :  { %v156_v24 = vpop.f32.mrf.mxu0 }
  0xba   :  { %v221_v56 = vpop.f32.mrf.mxu1  ;;  %v157_v2 = vadd.f32 %v1755_v1, %v156_v24 }
  0xbc   :  { %v222_v7 = vadd.f32 %v221_v56, %v157_v2 }
  0xbe   :  { %v263_v9 = vmax.f32 %v222_v7, 0.0 }
  0xc0   :  { %319 = vmatmul.f32.gmra.mxu2 %v263_v9 }
  0xc1   :  { %v159_v10 = vpop.f32.mrf.mxu0 }
  0xc2   :  { %v224_v12 = vpop.f32.mrf.mxu1  ;;  %v160_v15 = vadd.f32 %v1755_v1, %v159_v10 }
  0xc4   :  { %v225_v17 = vadd.f32 %v224_v12, %v160_v15 }
  0xc6   :  { %v264_v20 = vmax.f32 %v225_v17, 0.0  ;;  %v189_v17 = vpop.f32.mrf.mxu2 }
  0xc8   :  { %322 = vmatmul.f32.gmra.mxu2 %v264_v20 }
  0xc9   :  { %v162_v23 = vpop.f32.mrf.mxu0 }
  0xca   :  { %v227_v25 = vpop.f32.mrf.mxu1  ;;  %v163_v30 = vadd.f32 %v1755_v1, %v162_v23 }
  0xcc   :  { %v228_v32 = vadd.f32 %v227_v25, %v163_v30 }
  0xce   :  { %v265_v34 = vmax.f32 %v228_v32, 0.0 }
  0xd0   :  { %325 = vmatmul.f32.gmra.mxu2 %v265_v34  ;;  %v192_v34 = vpop.f32.mrf.mxu2 }
  0xd1   :  { %v165_v24 = vpop.f32.mrf.mxu0 }
  0xd2   :  { %v230_v56 = vpop.f32.mrf.mxu1  ;;  %v166_v2 = vadd.f32 %v1755_v1, %v165_v24 }
  0xd4   :  { %v231_v7 = vadd.f32 %v230_v56, %v166_v2 }
  0xd6   :  { %v266_v9 = vmax.f32 %v231_v7, 0.0 }
  0xd8   :  { %328 = vmatmul.f32.gmra.mxu2 %v266_v9  ;;  %v245_v46 = vpop.f32.mrf.mxu2 }
  0xd9   :  { %v168_v10 = vpop.f32.mrf.mxu0 }
  0xda   :  { %v233_v12 = vpop.f32.mrf.mxu1  ;;  %v169_v15 = vadd.f32 %v1755_v1, %v168_v10 }
  0xdc   :  { %v234_v20 = vadd.f32 %v233_v12, %v169_v15 }
  0xde   :  { %v267_v51 = vmax.f32 %v234_v20, 0.0  ;;  %v181_v20 = vadd.f32 %v1755_v1, %v180_v4 }
  0xe0   :  { %331 = vmatmul.f32.gmra.mxu2 %v267_v51 }
  0xe1   :  { %v171_v23 = vpop.f32.mrf.mxu0 }
  0xe2   :  { %v236_v25 = vpop.f32.mrf.mxu1  ;;  %v172_v30 = vadd.f32 %v1755_v1, %v171_v23 }
  0xe4   :  { %v237_v32 = vadd.f32 %v236_v25, %v172_v30  ;;  %v248_v25 = vpop.f32.mrf.mxu2  ;;  %v246_v30 = vadd.f32 %v245_v46, %v181_v20 }
  0xe6   :  { %v268_v8 = vmax.f32 %v237_v32, 0.0  ;;  %v271_v32 = vmax.f32 %v246_v30, 0.0 }
  0xe8   :  { %334 = vmatmul.f32.gmra.mxu2 %v268_v8  ;;  %v184_v8 = vadd.f32 %v1755_v1, %v183_v18 }
  0xe9   :  { %v174_v24 = vpop.f32.mrf.mxu0 }
  0xea   :  { %v239_v56 = vpop.f32.mrf.mxu1  ;;  %v175_v2 = vadd.f32 %v1755_v1, %v174_v24  ;;  %v249_v24 = vadd.f32 %v248_v25, %v184_v8 }
  0xec   :  { %v240_v7 = vadd.f32 %v239_v56, %v175_v2  ;;  %v251_v56 = vpop.f32.mrf.mxu2  ;;  %v187_v2 = vadd.f32 %v1755_v1, %v186_v16  ;;  %v1778_v16 = vstv %s2398_s4 }
  0xee   :  { %v269_v9 = vmax.f32 %v240_v7, 0.0  ;;  %v272_v7 = vmax.f32 %v249_v24, 0.0 }
  0xf0   :  { %337 = vmatmul.f32.gmra.mxu2 %v269_v9  ;;  %v252_v9 = vadd.f32 %v251_v56, %v187_v2 }
  0xf1   :  { %v177_v10 = vpop.f32.mrf.mxu0 }
  0xf2   :  { %v242_v12 = vpop.f32.mrf.mxu1  ;;  %v178_v51 = vadd.f32 %v1755_v1, %v177_v10  ;;  %v190_v10 = vadd.f32 %v1755_v1, %v189_v17 }
  0xf4   :  { %v243_v15 = vadd.f32 %v242_v12, %v178_v51  ;;  %v254_v0 = vpop.f32.mrf.mxu2  ;;  %v273_v12 = vmax.f32 %v252_v9, 0.0  ;;  %v193_v51 = vadd.f32 %v1755_v1, %v192_v34 }
  0xf5   :  { %v255_v4 = vadd.f32 %v254_v0, %v190_v10 }
  0xf6   :  { %v270_v23 = vmax.f32 %v243_v15, 0.0 }
  0xf7   :  { %v274_v46 = vmax.f32 %v255_v4, 0.0 }
  0xf8   :  { %340 = vmatmul.f32.gmra.mxu2 %v270_v23 }
  0xfc   :  { %v257_v15 = vpop.f32.mrf.mxu2 }
  0xfd   :  { %v258_v18 = vadd.f32 %v257_v15, %v193_v51 }
  0xff   :  { %v275_v20 = vmax.f32 %v258_v18, 0.0 }
 0x100   :  { %343 = vmatmul.f32.gmra.mxu2 %v271_v32 }
 0x108   :  { %346 = vmatmul.f32.gmra.mxu2 %v272_v7 }
 0x110   :  { %349 = vmatmul.f32.gmra.mxu2 %v273_v12 }
 0x118   :  { %352 = vmatmul.f32.gmra.mxu2 %v274_v46 }
 0x120   :  { %355 = vmatmul.f32.gmra.mxu2 %v275_v20 }
 0x12b   :  { %v1773_v23 = vpop.f32.mrf.mxu2 }
 0x133   :  { %v314_v25 = vpop.f32.mrf.mxu2 }
 0x134   :  { %v315_v17 = vadd.f32 %v314_v25, %v1778_v16 }
 0x136   :  { %v363_v0 = vsel %vm359_vm0, %v315_v17, -inf }
 0x137   :  { %364 = vmax.xlane.f32.xlu0 %v363_v0 }
 0x13b   :  { %v317_v1 = vpop.f32.mrf.mxu2 }
 0x13c   :  { %v318_v34 = vadd.f32 %v317_v1, %v1778_v16 }
 0x13e   :  { %v366_v30 = vsel %vm359_vm0, %v318_v34, -inf }
 0x13f   :  { %367 = vmax.xlane.f32.xlu0 %v366_v30 }
 0x143   :  { %v320_v8 = vpop.f32.mrf.mxu2 }
 0x144   :  { %v321_v32 = vadd.f32 %v320_v8, %v1778_v16 }
 0x146   :  { %v369_v24 = vsel %vm359_vm0, %v321_v32, -inf }
 0x147   :  { %370 = vmax.xlane.f32.xlu1 %v369_v24 }
 0x14b   :  { %v323_v56 = vpop.f32.mrf.mxu2 }
 0x14c   :  { %v324_v2 = vadd.f32 %v323_v56, %v1778_v16 }
 0x14e   :  { %v372_v7 = vsel %vm359_vm0, %v324_v2, -inf }
 0x14f   :  { %373 = vmax.xlane.f32.xlu1 %v372_v7 }
 0x153   :  { %v326_v9 = vpop.f32.mrf.mxu2 }
 0x154   :  { %v327_v10 = vadd.f32 %v326_v9, %v1778_v16 }
 0x156   :  { %v375_v12 = vsel %vm359_vm0, %v327_v10, -inf }
 0x157   :  { %376 = vmax.xlane.f32.xlu2 %v375_v12 }
 0x15b   :  { %v329_v4 = vpop.f32.mrf.mxu2 }
 0x15c   :  { %v330_v51 = vadd.f32 %v329_v4, %v1778_v16 }
 0x15e   :  { %v378_v46 = vsel %vm359_vm0, %v330_v51, -inf }
 0x15f   :  { %379 = vmax.xlane.f32.xlu2 %v378_v46 }
 0x163   :  { %v332_v15 = vpop.f32.mrf.mxu2 }
 0x164   :  { %v1793_v18 = vadd.f32 %v332_v15, %v1778_v16 }
 0x166   :  { %v381_v20 = vsel %vm359_vm0, %v1793_v18, -inf }
 0x167   :  { %382 = vmax.xlane.f32.xlu0 %v381_v20 }
 0x16b   :  { %v335_v25 = vpop.f32.mrf.mxu2 }
 0x16c   :  { %v1798_v0 = vadd.f32 %v335_v25, %v1778_v16 }
 0x16e   :  { %v384_v1 = vsel %vm359_vm0, %v1798_v0, -inf }
 0x16f   :  { %385 = vmax.xlane.f32.xlu2 %v384_v1 }
 0x173   :  { %v338_v8 = vpop.f32.mrf.mxu2 }
 0x174   :  { %v1807_v20 = vadd.f32 %v338_v8, %v1778_v16 }
 0x17b   :  { %v341_v4 = vpop.f32.mrf.mxu2 }
 0x1aa   :  { %v365_v30 = vpop.xlane.xlu0 %364 }
 0x1ab   :  { %v409_v24 = vsub.f32 %v315_v17, %v365_v30  ;;  %v387_v17 = vsel %vm359_vm0, %v1807_v20, -inf }
 0x1ad   :  { %v426_v56 = vmul.f32 1.442695, %v409_v24 }
 0x1af   :  { %1232 = vpow2.f32 %v426_v56  ;;  %v344_v56 = vpop.f32.mrf.mxu2 }
 0x1b2   :  { %v368_v7 = vpop.xlane.xlu0 %367 }
 0x1b3   :  { %v410_v9 = vsub.f32 %v318_v34, %v368_v7  ;;  %v1816_v7 = vadd.f32 %v341_v4, %v1778_v16 }
 0x1b5   :  { %v1802_v12 = vpop.eup %1232  ;;  %v428_v46 = vmul.f32 1.442695, %v410_v9 }
 0x1b6   :  { %v459_v15 = vsel %vm359_vm0, %v1802_v12, 0.0 }
 0x1b7   :  { %1234 = vpow2.f32 %v428_v46  ;;  %460 = vadd.xlane.f32.xlu1 %v459_v15 }
 0x1ba   :  { %v371_v25 = vpop.xlane.xlu1 %370 }
 0x1bb   :  { %v411_v1 = vsub.f32 %v321_v32, %v371_v25  ;;  %v390_v32 = vsel %vm359_vm0, %v1816_v7, -inf }
 0x1bd   :  { %v1811_v30 = vpop.eup %1234  ;;  %v430_v34 = vmul.f32 1.442695, %v411_v1  ;;  %v347_v1 = vpop.f32.mrf.mxu2 }
 0x1be   :  { %v462_v24 = vsel %vm359_vm0, %v1811_v30, 0.0 }
 0x1bf   :  { %1236 = vpow2.f32 %v430_v34  ;;  %388 = vmax.xlane.f32.xlu1 %v387_v17  ;;  %463 = vadd.xlane.f32.xlu0 %v462_v24  ;;  %v1825_v17 = vadd.f32 %v344_v56, %v1778_v16 }
 0x1c2   :  { %v374_v8 = vpop.xlane.xlu1 %373 }
 0x1c3   :  { %v412_v9 = vsub.f32 %v324_v2, %v374_v8  ;;  %v393_v8 = vsel %vm359_vm0, %v1825_v17, -inf }
 0x1c5   :  { %v1820_v46 = vpop.eup %1236  ;;  %v432_v15 = vmul.f32 1.442695, %v412_v9  ;;  %v350_v56 = vpop.f32.mrf.mxu2 }
 0x1c6   :  { %v465_v25 = vsel %vm359_vm0, %v1820_v46, 0.0 }
 0x1c7   :  { %1238 = vpow2.f32 %v432_v15  ;;  %466 = vadd.xlane.f32.xlu2 %v465_v25  ;;  %391 = vmax.xlane.f32.xlu0 %v390_v32  ;;  %v1834_v32 = vadd.f32 %v347_v1, %v1778_v16 }
 0x1ca   :  { %v377_v4 = vpop.xlane.xlu2 %376 }
 0x1cb   :  { %v413_v34 = vsub.f32 %v327_v10, %v377_v4  ;;  %v396_v4 = vsel %vm359_vm0, %v1834_v32, -inf }
 0x1cd   :  { %v1827_v24 = vpop.eup %1238  ;;  %v434_v2 = vmul.f32 1.442695, %v413_v34 }
 0x1ce   :  { %v468_v9 = vsel %vm359_vm0, %v1827_v24, 0.0 }
 0x1cf   :  { %1240 = vpow2.f32 %v434_v2  ;;  %394 = vmax.xlane.f32.xlu2 %v393_v8  ;;  %469 = vadd.xlane.f32.xlu1 %v468_v9  ;;  %v1843_v2 = vadd.f32 %v350_v56, %v1778_v16 }
 0x1d1   :  { %v399_v60 = vsel %vm359_vm0, %v1843_v2, -inf }
 0x1d2   :  { %v380_v15 = vpop.xlane.xlu2 %379 }
 0x1d3   :  { %v414_v25 = vsub.f32 %v330_v51, %v380_v15  ;;  %v353_v51 = vpop.f32.mrf.mxu2 }
 0x1d5   :  { %v1836_v41 = vpop.eup %1240  ;;  %v436_v10 = vmul.f32 1.442695, %v414_v25 }
 0x1d6   :  { %v471_v34 = vsel %vm359_vm0, %v1836_v41, 0.0 }
 0x1d7   :  { %1242 = vpow2.f32 %v436_v10  ;;  %397 = vmax.xlane.f32.xlu1 %v396_v4  ;;  %472 = vadd.xlane.f32.xlu0 %v471_v34  ;;  %v1853_v10 = vadd.f32 %v353_v51, %v1778_v16 }
 0x1da   :  { %v383_v1 = vpop.xlane.xlu0 %382 }
 0x1db   :  { %v415_v8 = vsub.f32 %v1793_v18, %v383_v1  ;;  %v402_v1 = vsel %vm359_vm0, %v1853_v10, -inf  ;;  %v356_v36 = vpop.f32.mrf.mxu2 }
 0x1dd   :  { %v1846_v9 = vpop.eup %1242  ;;  %v438_v15 = vmul.f32 1.442695, %v415_v8 }
 0x1de   :  { %v474_v25 = vsel %vm359_vm0, %v1846_v9, 0.0 }
 0x1df   :  { %1244 = vpow2.f32 %v438_v15  ;;  %475 = vadd.xlane.f32.xlu2 %v474_v25  ;;  %400 = vmax.xlane.f32.xlu0 %v399_v60  ;;  %v1863_v60 = vadd.f32 %v356_v36, %v1778_v16  ;;  %v1873_v25 = vadd.f32 %v1773_v23, %v1778_v16  ;;  %v744_v36 = vld [vmem:[#allocation3] sm:$0xff] }
 0x1e0   :  { %1228 = vmatpush.msra.mxu3 %v744_v36  ;;  %809 = vmatpush.msrb.mxu2 %v744_v36 }
 0x1e1   :  { %v405_v15 = vsel %vm359_vm0, %v1863_v60, -inf }
 0x1e2   :  { %v386_v56 = vpop.xlane.xlu2 %385 }
 0x1e3   :  { %v416_v4 = vsub.f32 %v1798_v0, %v386_v56  ;;  %v360_v56 = vsel %vm359_vm0, %v1873_v25, -inf }
 0x1e5   :  { %v1856_v18 = vpop.eup %1244  ;;  %v440_v34 = vmul.f32 1.442695, %v416_v4 }
 0x1e6   :  { %v477_v8 = vsel %vm359_vm0, %v1856_v18, 0.0 }
 0x1e7   :  { %1246 = vpow2.f32 %v440_v34  ;;  %403 = vmax.xlane.f32.xlu2 %v402_v1  ;;  %478 = vadd.xlane.f32.xlu1 %v477_v8 }
 0x1ed   :  { %v1865_v51 = vpop.eup %1246 }
 0x1ee   :  { %v480_v0 = vsel %vm359_vm0, %v1865_v51, 0.0 }
 0x1ef   :  { %481 = vadd.xlane.f32.xlu0 %v480_v0  ;;  %406 = vmax.xlane.f32.xlu1 %v405_v15 }
 0x1f7   :  { %361 = vmax.xlane.f32.xlu0 %v360_v56 }
 0x22a   :  { %v461_v4 = vpop.xlane.xlu1 %460 }
 0x22b   :  { %1248 = vrcp.f32 %v461_v4  ;;  %v530_v16 = vand.u32 2147483648, %v461_v4  ;;  %v528_v22 = vand.u32 2147483647, %v461_v4  ;;  %vm524_vm2 = vweird.f32 %v461_v4 }
 0x22d   :  { %v531_v36 = vor.u32 1.1754944e-38, %v530_v16  ;;  %vm529_vm4 = vcmp.eq.f32.partialorder %v528_v22, 8.507059e+37 }
 0x231   :  { %v1249_v34 = vpop.eup %1248 }
 0x232   :  { %v520_v1 = vmul.f32 %v1249_v34, %v461_v4  ;;  %v389_v8 = vpop.xlane.xlu1 %388  ;;  %v464_v29 = vpop.xlane.xlu0 %463  ;;  %vm525_vm1 = vweird.f32 %v1249_v34 }
 0x233   :  { %v417_v0 = vsub.f32 %v1807_v20, %v389_v8  ;;  %1250 = vrcp.f32 %v464_v29  ;;  %vm526_vm3 = vmor %vm524_vm2, %vm525_vm1  ;;  %vm539_vm6 = vweird.f32 %v464_v29 }
 0x234   :  { %v521_v15 = vsub.f32 1.0, %v520_v1 }
 0x235   :  { %v442_v27 = vmul.f32 1.442695, %v417_v0 }
 0x236   :  { %v522_v23 = vmul.f32 %v1249_v34, %v521_v15 }
 0x237   :  { %1252 = vpow2.f32 %v442_v27 }
 0x238   :  { %v523_v56 = vadd.f32 %v1249_v34, %v522_v23  ;;  %v545_v23 = vand.u32 2147483648, %v464_v29 }
 0x239   :  { %v1251_v21 = vpop.eup %1250 }
 0x23a   :  { %v535_v14 = vmul.f32 %v1251_v21, %v464_v29  ;;  %v467_v13 = vpop.xlane.xlu2 %466  ;;  %v392_v6 = vpop.xlane.xlu0 %391  ;;  %v527_v5 = vsel %vm526_vm3, %v1249_v34, %v523_v56  ;;  %vm540_vm5 = vweird.f32 %v1251_v21  ;;  %v546_v22 = vor.u32 1.1754944e-38, %v545_v23 }
 0x23b   :  { %1254 = vrcp.f32 %v467_v13  ;;  %v418_v20 = vsub.f32 %v1816_v7, %v392_v6  ;;  %v532_v8 = vsel %vm529_vm4, %v531_v36, %v527_v5  ;;  %v543_v5 = vand.u32 2147483647, %v464_v29  ;;  %vm541_vm7 = vmor %vm539_vm6, %vm540_vm5 }
 0x23c   :  { %v536_v1 = vsub.f32 1.0, %v535_v14  ;;  %v1882_v27 = vmul.f32 %v1802_v12, %v532_v8  ;;  %vm554_vm10 = vweird.f32 %v467_v13 }
 0x23d   :  { %v1879_v0 = vpop.eup %1252  ;;  %v444_v15 = vmul.f32 1.442695, %v418_v20  ;;  %vm544_vm8 = vcmp.eq.f32.partialorder %v543_v5, 8.507059e+37 }
 0x23e   :  { %v537_v4 = vmul.f32 %v1251_v21, %v536_v1  ;;  %v483_v16 = vsel %vm359_vm0, %v1879_v0, 0.0  ;;  %1165 = vmatmul.msk.f32.vlgmr.msra.gmra.mxu3 %vm359_vm0, %v1882_v27  ;;  %1140 = vst.msk [vmem:[%s2403_s9 + $0x8] sm:$0xff] %vm359_vm0, %v1882_v27 }
 0x23f   :  { %1256 = vpow2.f32 %v444_v15  ;;  %484 = vadd.xlane.f32.xlu2 %v483_v16 }
 0x240   :  { %v538_v6 = vadd.f32 %v1251_v21, %v537_v4  ;;  %v560_v4 = vand.u32 2147483648, %v467_v13 }
 0x241   :  { %v1255_v14 = vpop.eup %1254 }
 0x242   :  { %v550_v12 = vmul.f32 %v1255_v14, %v467_v13  ;;  %v395_v7 = vpop.xlane.xlu2 %394  ;;  %v470_v34 = vpop.xlane.xlu1 %469  ;;  %v542_v56 = vsel %vm541_vm7, %v1251_v21, %v538_v6  ;;  %vm555_vm9 = vweird.f32 %v1255_v14  ;;  %v558_v21 = vand.u32 2147483647, %v467_v13 }
 0x243   :  { %v419_v36 = vsub.f32 %v1825_v17, %v395_v7  ;;  %1258 = vrcp.f32 %v470_v34  ;;  %v547_v1 = vsel %vm544_vm8, %v546_v22, %v542_v56  ;;  %vm556_vm11 = vmor %vm554_vm10, %vm555_vm9  ;;  %v561_v5 = vor.u32 1.1754944e-38, %v560_v4 }
 0x244   :  { %v551_v20 = vsub.f32 1.0, %v550_v12  ;;  %v1897_v16 = vmul.f32 %v1811_v30, %v547_v1  ;;  %vm559_vm12 = vcmp.eq.f32.partialorder %v558_v21, 8.507059e+37  ;;  %vm569_vm14 = vweird.f32 %v470_v34 }
 0x245   :  { %v1894_v8 = vpop.eup %1256  ;;  %v446_v15 = vmul.f32 1.442695, %v419_v36 }
 0x246   :  { %v552_v29 = vmul.f32 %v1255_v14, %v551_v20  ;;  %v486_v23 = vsel %vm359_vm0, %v1894_v8, 0.0  ;;  %1166 = vmatmul.msk.f32.gmra.mxu3 %vm359_vm0, %v1897_v16  ;;  %1141 = vst.msk [vmem:[%s2403_s9 + $0x10] sm:$0xff] %vm359_vm0, %v1897_v16 }
 0x247   :  { %1260 = vpow2.f32 %v446_v15  ;;  %487 = vadd.xlane.f32.xlu1 %v486_v23 }
 0x248   :  { %v553_v30 = vadd.f32 %v1255_v14, %v552_v29  ;;  %v575_v29 = vand.u32 2147483648, %v470_v34 }
 0x249   :  { %v1259_v17 = vpop.eup %1258 }
 0x24a   :  { %v565_v6 = vmul.f32 %v1259_v17, %v470_v34  ;;  %v398_v22 = vpop.xlane.xlu1 %397  ;;  %v473_v12 = vpop.xlane.xlu0 %472  ;;  %v557_v7 = vsel %vm556_vm11, %v1255_v14, %v553_v30  ;;  %vm570_vm13 = vweird.f32 %v1259_v17  ;;  %v576_v21 = vor.u32 1.1754944e-38, %v575_v29 }
 0x24b   :  { %v420_v56 = vsub.f32 %v1834_v32, %v398_v22  ;;  %1262 = vrcp.f32 %v473_v12  ;;  %v562_v20 = vsel %vm559_vm12, %v561_v5, %v557_v7  ;;  %v573_v32 = vand.u32 2147483647, %v470_v34  ;;  %vm571_vm15 = vmor %vm569_vm14, %vm570_vm13 }
 0x24c   :  { %v566_v36 = vsub.f32 1.0, %v565_v6  ;;  %v1912_v23 = vmul.f32 %v1820_v46, %v562_v20  ;;  %vm584_vm3 = vweird.f32 %v473_v12 }
 0x24d   :  { %v1909_v1 = vpop.eup %1260  ;;  %v448_v15 = vmul.f32 1.442695, %v420_v56  ;;  %vm574_vm1 = vcmp.eq.f32.partialorder %v573_v32, 8.507059e+37 }
 0x24e   :  { %v567_v13 = vmul.f32 %v1259_v17, %v566_v36  ;;  %v489_v4 = vsel %vm359_vm0, %v1909_v1, 0.0  ;;  %1167 = vmatmul.msk.f32.gmra.mxu3 %vm359_vm0, %v1912_v23  ;;  %1142 = vst.msk [vmem:[%s2403_s9 + $0x18] sm:$0xff] %vm359_vm0, %v1912_v23 }
 0x24f   :  { %1264 = vpow2.f32 %v448_v15  ;;  %490 = vadd.xlane.f32.xlu2 %v489_v4 }
 0x250   :  { %v568_v46 = vadd.f32 %v1259_v17, %v567_v13  ;;  %v590_v13 = vand.u32 2147483648, %v473_v12 }
 0x251   :  { %v1263_v14 = vpop.eup %1262 }
 0x252   :  { %v580_v30 = vmul.f32 %v1263_v14, %v473_v12  ;;  %v476_v5 = vpop.xlane.xlu2 %475  ;;  %v401_v6 = vpop.xlane.xlu0 %400  ;;  %v572_v22 = vsel %vm571_vm15, %v1259_v17, %v568_v46  ;;  %vm585_vm2 = vweird.f32 %v1263_v14  ;;  %v591_v46 = vor.u32 1.1754944e-38, %v590_v13 }
 0x253   :  { %1266 = vrcp.f32 %v476_v5  ;;  %v421_v7 = vsub.f32 %v1843_v2, %v401_v6  ;;  %v577_v36 = vsel %vm574_vm1, %v576_v21, %v572_v22  ;;  %v588_v2 = vand.u32 2147483647, %v473_v12  ;;  %vm586_vm4 = vmor %vm584_vm3, %vm585_vm2 }
 0x254   :  { %v581_v56 = vsub.f32 1.0, %v580_v30  ;;  %v1927_v4 = vmul.f32 %v1827_v24, %v577_v36  ;;  %v745_v24 = vld [vmem:[#allocation3 + $0x8] sm:$0xff]  ;;  %vm599_vm7 = vweird.f32 %v476_v5 }
 0x255   :  { %v1924_v20 = vpop.eup %1264  ;;  %v450_v15 = vmul.f32 1.442695, %v421_v7  ;;  %874 = vmatpush.msrb.mxu3 %v745_v24  ;;  %vm589_vm5 = vcmp.eq.f32.partialorder %v588_v2, 8.507059e+37  ;;  %v605_v24 = vand.u32 2147483648, %v476_v5 }
 0x256   :  { %v582_v34 = vmul.f32 %v1263_v14, %v581_v56  ;;  %v492_v29 = vsel %vm359_vm0, %v1924_v20, 0.0  ;;  %1168 = vmatmul.msk.f32.gmra.mxu3 %vm359_vm0, %v1927_v4  ;;  %1143 = vst.msk [vmem:[%s2403_s9 + $0x20] sm:$0xff] %vm359_vm0, %v1927_v4 }
 0x257   :  { %1268 = vpow2.f32 %v450_v15  ;;  %493 = vadd.xlane.f32.xlu0 %v492_v29  ;;  %v606_v2 = vor.u32 1.1754944e-38, %v605_v24 }
 0x258   :  { %v583_v17 = vadd.f32 %v1263_v14, %v582_v34 }
 0x259   :  { %v1267_v32 = vpop.eup %1266 }
 0x25a   :  { %v595_v21 = vmul.f32 %v1267_v32, %v476_v5  ;;  %v404_v30 = vpop.xlane.xlu2 %403  ;;  %v479_v6 = vpop.xlane.xlu1 %478  ;;  %v587_v22 = vsel %vm586_vm4, %v1263_v14, %v583_v17  ;;  %vm600_vm6 = vweird.f32 %v1267_v32 }
 0x25b   :  { %v422_v7 = vsub.f32 %v1853_v10, %v404_v30  ;;  %1270 = vrcp.f32 %v479_v6  ;;  %v592_v36 = vsel %vm589_vm5, %v591_v46, %v587_v22  ;;  %v603_v10 = vand.u32 2147483647, %v476_v5  ;;  %vm601_vm8 = vmor %vm599_vm7, %vm600_vm6 }
 0x25c   :  { %v596_v56 = vsub.f32 1.0, %v595_v21  ;;  %v1942_v12 = vmul.f32 %v1836_v41, %v592_v36  ;;  %v618_v63 = vand.u32 2147483647, %v479_v6  ;;  %vm614_vm11 = vweird.f32 %v479_v6 }
 0x25d   :  { %v1939_v15 = vpop.eup %1268  ;;  %v452_v29 = vmul.f32 1.442695, %v422_v7  ;;  %vm604_vm9 = vcmp.eq.f32.partialorder %v603_v10, 8.507059e+37 }
 0x25e   :  { %v597_v34 = vmul.f32 %v1267_v32, %v596_v56  ;;  %v495_v13 = vsel %vm359_vm0, %v1939_v15, 0.0  ;;  %1169 = vmatmul.msk.f32.gmra.mxu3 %vm359_vm0, %v1942_v12  ;;  %1144 = vst.msk [vmem:[%s2403_s9 + $0x28] sm:$0xff] %vm359_vm0, %v1942_v12  ;;  %vm619_vm13 = vcmp.eq.f32.partialorder %v618_v63, 8.507059e+37 }
 0x25f   :  { %1272 = vpow2.f32 %v452_v29  ;;  %496 = vadd.xlane.f32.xlu1 %v495_v13  ;;  %v620_v29 = vand.u32 2147483648, %v479_v6 }
 0x260   :  { %v598_v41 = vadd.f32 %v1267_v32, %v597_v34 }
 0x261   :  { %v1271_v14 = vpop.eup %1270 }
 0x262   :  { %v610_v17 = vmul.f32 %v1271_v14, %v479_v6  ;;  %v407_v46 = vpop.xlane.xlu1 %406  ;;  %v482_v21 = vpop.xlane.xlu0 %481  ;;  %v602_v30 = vsel %vm601_vm8, %v1267_v32, %v598_v41  ;;  %vm615_vm10 = vweird.f32 %v1271_v14  ;;  %v621_v32 = vor.u32 1.1754944e-38, %v620_v29 }
 0x263   :  { %v423_v22 = vsub.f32 %v1863_v60, %v407_v46  ;;  %1274 = vrcp.f32 %v482_v21  ;;  %v607_v56 = vsel %vm604_vm9, %v606_v2, %v602_v30  ;;  %vm616_vm12 = vmor %vm614_vm11, %vm615_vm10  ;;  %vm629_vm15 = vweird.f32 %v482_v21 }
 0x264   :  { %v611_v7 = vsub.f32 1.0, %v610_v17  ;;  %v1957_v5 = vmul.f32 %v1846_v9, %v607_v56  ;;  %v635_v56 = vand.u32 2147483648, %v482_v21 }
 0x265   :  { %v1954_v36 = vpop.eup %1272  ;;  %v454_v13 = vmul.f32 1.442695, %v423_v22 }
 0x266   :  { %v612_v34 = vmul.f32 %v1271_v14, %v611_v7  ;;  %v498_v24 = vsel %vm359_vm0, %v1954_v36, 0.0  ;;  %1170 = vmatmul.msk.f32.gmra.mxu3 %vm359_vm0, %v1957_v5  ;;  %1145 = vst.msk [vmem:[%s2403_s9 + $0x30] sm:$0xff] %vm359_vm0, %v1957_v5 }
 0x267   :  { %1276 = vpow2.f32 %v454_v13  ;;  %499 = vadd.xlane.f32.xlu2 %v498_v24 }
 0x268   :  { %v613_v9 = vadd.f32 %v1271_v14, %v612_v34 }
 0x269   :  { %v1275_v60 = vpop.eup %1274 }
 0x26a   :  { %v625_v10 = vmul.f32 %v1275_v60, %v482_v21  ;;  %v362_v41 = vpop.xlane.xlu0 %361  ;;  %v617_v2 = vsel %vm616_vm12, %v1271_v14, %v613_v9  ;;  %vm630_vm14 = vweird.f32 %v1275_v60  ;;  %v636_v14 = vor.u32 1.1754944e-38, %v635_v56 }
 0x26b   :  { %v408_v17 = vsub.f32 %v1873_v25, %v362_v41  ;;  %v622_v46 = vsel %vm619_vm13, %v621_v32, %v617_v2  ;;  %v633_v25 = vand.u32 2147483647, %v482_v21  ;;  %vm631_vm1 = vmor %vm629_vm15, %vm630_vm14 }
 0x26c   :  { %v626_v30 = vsub.f32 1.0, %v625_v10  ;;  %v1970_v22 = vmul.f32 %v1856_v18, %v622_v46 }
 0x26d   :  { %v1972_v7 = vpop.eup %1276  ;;  %v424_v13 = vmul.f32 1.442695, %v408_v17  ;;  %vm634_vm2 = vcmp.eq.f32.partialorder %v633_v25, 8.507059e+37 }
 0x26e   :  { %v627_v6 = vmul.f32 %v1275_v60, %v626_v30  ;;  %1146 = vst.msk [vmem:[%s2403_s9 + $0x38] sm:$0xff] %vm359_vm0, %v1970_v22  ;;  %v501_v63 = vsel %vm359_vm0, %v1972_v7, 0.0  ;;  %1171 = vmatmul.msk.f32.gmra.mxu3 %vm359_vm0, %v1970_v22 }
 0x26f   :  { %1278 = vpow2.f32 %v424_v13  ;;  %502 = vadd.xlane.f32.xlu0 %v501_v63 }
 0x270   :  { %v628_v18 = vadd.f32 %v1275_v60, %v627_v6 }
 0x272   :  { %v632_v29 = vsel %vm631_vm1, %v1275_v60, %v628_v18 }
 0x273   :  { %v637_v34 = vsel %vm634_vm2, %v636_v14, %v632_v29 }
 0x274   :  { %v1984_v24 = vmul.f32 %v1865_v51, %v637_v34 }
 0x275   :  { %v1986_v9 = vpop.eup %1278 }
 0x276   :  { %1147 = vst.msk [vmem:[%s2403_s9 + $0x40] sm:$0xff] %vm359_vm0, %v1984_v24  ;;  %v456_v21 = vsel %vm359_vm0, %v1986_v9, 0.0  ;;  %1172 = vmatmul.msk.f32.gmra.mxu3 %vm359_vm0, %v1984_v24 }
 0x277   :  { %457 = vadd.xlane.f32.xlu1 %v456_v21 }
 0x2b2   :  { %v485_v60 = vpop.xlane.xlu2 %484 }
 0x2b3   :  { %1280 = vrcp.f32 %v485_v60  ;;  %v650_v2 = vand.u32 2147483648, %v485_v60  ;;  %v648_v46 = vand.u32 2147483647, %v485_v60  ;;  %vm644_vm4 = vweird.f32 %v485_v60 }
 0x2b5   :  { %v651_v13 = vor.u32 1.1754944e-38, %v650_v2  ;;  %vm649_vm6 = vcmp.eq.f32.partialorder %v648_v46, 8.507059e+37 }
 0x2b9   :  { %v1281_v32 = vpop.eup %1280 }
 0x2ba   :  { %v640_v51 = vmul.f32 %v1281_v32, %v485_v60  ;;  %v488_v10 = vpop.xlane.xlu1 %487  ;;  %vm645_vm3 = vweird.f32 %v1281_v32 }
 0x2bb   :  { %1282 = vrcp.f32 %v488_v10  ;;  %vm646_vm5 = vmor %vm644_vm4, %vm645_vm3  ;;  %v665_v34 = vand.u32 2147483648, %v488_v10  ;;  %v663_v60 = vand.u32 2147483647, %v488_v10  ;;  %vm659_vm8 = vweird.f32 %v488_v10 }
 0x2bc   :  { %v641_v41 = vsub.f32 1.0, %v640_v51 }
 0x2bd   :  { %vm664_vm10 = vcmp.eq.f32.partialorder %v663_v60, 8.507059e+37 }
 0x2be   :  { %v642_v17 = vmul.f32 %v1281_v32, %v641_v41  ;;  %v666_v41 = vor.u32 1.1754944e-38, %v665_v34 }
 0x2c0   :  { %v643_v30 = vadd.f32 %v1281_v32, %v642_v17 }
 0x2c1   :  { %v1283_v56 = vpop.eup %1282 }
 0x2c2   :  { %v655_v6 = vmul.f32 %v1283_v56, %v488_v10  ;;  %v491_v63 = vpop.xlane.xlu2 %490  ;;  %v647_v25 = vsel %vm646_vm5, %v1281_v32, %v643_v30  ;;  %vm660_vm7 = vweird.f32 %v1283_v56 }
 0x2c3   :  { %1284 = vrcp.f32 %v491_v63  ;;  %v652_v18 = vsel %vm649_vm6, %v651_v13, %v647_v25  ;;  %vm661_vm9 = vmor %vm659_vm8, %vm660_vm7  ;;  %v678_v10 = vand.u32 2147483647, %v491_v63  ;;  %vm674_vm12 = vweird.f32 %v491_v63 }
 0x2c4   :  { %v656_v14 = vsub.f32 1.0, %v655_v6  ;;  %v1998_v29 = vmul.f32 %v1879_v0, %v652_v18  ;;  %v680_v6 = vand.u32 2147483648, %v491_v63 }
 0x2c5   :  { %vm679_vm14 = vcmp.eq.f32.partialorder %v678_v10, 8.507059e+37 }
 0x2c6   :  { %v657_v21 = vmul.f32 %v1283_v56, %v656_v14  ;;  %1173 = vmatmul.msk.f32.gmra.mxu3 %vm359_vm0, %v1998_v29  ;;  %1148 = vst.msk [vmem:[%s2403_s9 + $0x48] sm:$0xff] %vm359_vm0, %v1998_v29  ;;  %v681_v14 = vor.u32 1.1754944e-38, %v680_v6 }
 0x2c8   :  { %v658_v32 = vadd.f32 %v1283_v56, %v657_v21 }
 0x2c9   :  { %v1285_v51 = vpop.eup %1284 }
 0x2ca   :  { %v670_v0 = vmul.f32 %v1285_v51, %v491_v63  ;;  %v494_v2 = vpop.xlane.xlu0 %493  ;;  %v662_v17 = vsel %vm661_vm9, %v1283_v56, %v658_v32  ;;  %vm675_vm11 = vweird.f32 %v1285_v51 }
 0x2cb   :  { %1286 = vrcp.f32 %v494_v2  ;;  %v667_v46 = vsel %vm664_vm10, %v666_v41, %v662_v17  ;;  %vm676_vm13 = vmor %vm674_vm12, %vm675_vm11  ;;  %v695_v17 = vand.u32 2147483648, %v494_v2  ;;  %v693_v63 = vand.u32 2147483647, %v494_v2 }
 0x2cc   :  { %v671_v30 = vsub.f32 1.0, %v670_v0  ;;  %v2008_v13 = vmul.f32 %v1894_v8, %v667_v46  ;;  %vm689_vm1 = vweird.f32 %v494_v2 }
 0x2cd   :  { %vm694_vm3 = vcmp.eq.f32.partialorder %v693_v63, 8.507059e+37 }
 0x2ce   :  { %v672_v25 = vmul.f32 %v1285_v51, %v671_v30  ;;  %1174 = vmatmul.msk.f32.gmra.mxu3 %vm359_vm0, %v2008_v13  ;;  %1149 = vst.msk [vmem:[%s2403_s9 + $0x50] sm:$0xff] %vm359_vm0, %v2008_v13  ;;  %v696_v30 = vor.u32 1.1754944e-38, %v695_v17 }
 0x2d0   :  { %v673_v56 = vadd.f32 %v1285_v51, %v672_v25 }
 0x2d1   :  { %v1287_v18 = vpop.eup %1286 }
 0x2d2   :  { %v685_v8 = vmul.f32 %v1287_v18, %v494_v2  ;;  %v497_v34 = vpop.xlane.xlu1 %496  ;;  %v677_v21 = vsel %vm676_vm13, %v1285_v51, %v673_v56  ;;  %vm690_vm15 = vweird.f32 %v1287_v18 }
 0x2d3   :  { %1288 = vrcp.f32 %v497_v34  ;;  %v682_v60 = vsel %vm679_vm14, %v681_v14, %v677_v21  ;;  %vm691_vm2 = vmor %vm689_vm1, %vm690_vm15  ;;  %v710_v21 = vand.u32 2147483648, %v497_v34  ;;  %v708_v2 = vand.u32 2147483647, %v497_v34 }
 0x2d4   :  { %v686_v32 = vsub.f32 1.0, %v685_v8  ;;  %v2018_v41 = vmul.f32 %v1909_v1, %v682_v60  ;;  %vm704_vm5 = vweird.f32 %v497_v34 }
 0x2d5   :  { %vm709_vm7 = vcmp.eq.f32.partialorder %v708_v2, 8.507059e+37 }
 0x2d6   :  { %v687_v0 = vmul.f32 %v1287_v18, %v686_v32  ;;  %1175 = vmatmul.msk.f32.gmra.mxu3 %vm359_vm0, %v2018_v41  ;;  %1150 = vst.msk [vmem:[%s2403_s9 + $0x58] sm:$0xff] %vm359_vm0, %v2018_v41  ;;  %v711_v32 = vor.u32 1.1754944e-38, %v710_v21 }
 0x2d8   :  { %v688_v51 = vadd.f32 %v1287_v18, %v687_v0 }
 0x2d9   :  { %v1289_v46 = vpop.eup %1288 }
 0x2da   :  { %v700_v1 = vmul.f32 %v1289_v46, %v497_v34  ;;  %v500_v6 = vpop.xlane.xlu2 %499  ;;  %v692_v25 = vsel %vm691_vm2, %v1287_v18, %v688_v51  ;;  %vm705_vm4 = vweird.f32 %v1289_v46 }
 0x2db   :  { %1290 = vrcp.f32 %v500_v6  ;;  %v697_v56 = vsel %vm694_vm3, %v696_v30, %v692_v25  ;;  %vm706_vm6 = vmor %vm704_vm5, %vm705_vm4  ;;  %v725_v25 = vand.u32 2147483648, %v500_v6  ;;  %vm719_vm9 = vweird.f32 %v500_v6 }
 0x2dc   :  { %v701_v10 = vsub.f32 1.0, %v700_v1  ;;  %v2028_v14 = vmul.f32 %v1924_v20, %v697_v56 }
 0x2dd   :  { %v726_v56 = vor.u32 1.1754944e-38, %v725_v25 }
 0x2de   :  { %v702_v8 = vmul.f32 %v1289_v46, %v701_v10  ;;  %1176 = vmatmul.msk.f32.gmra.mxu3 %vm359_vm0, %v2028_v14  ;;  %1151 = vst.msk [vmem:[%s2403_s9 + $0x60] sm:$0xff] %vm359_vm0, %v2028_v14  ;;  %v723_v10 = vand.u32 2147483647, %v500_v6 }
 0x2e0   :  { %v703_v18 = vadd.f32 %v1289_v46, %v702_v8  ;;  %vm724_vm11 = vcmp.eq.f32.partialorder %v723_v10, 8.507059e+37 }
 0x2e1   :  { %v1291_v60 = vpop.eup %1290 }
 0x2e2   :  { %v715_v20 = vmul.f32 %v1291_v60, %v500_v6  ;;  %v503_v0 = vpop.xlane.xlu0 %502  ;;  %v707_v17 = vsel %vm706_vm6, %v1289_v46, %v703_v18  ;;  %vm720_vm8 = vweird.f32 %v1291_v60 }
 0x2e3   :  { %1292 = vrcp.f32 %v503_v0  ;;  %v712_v51 = vsel %vm709_vm7, %v711_v32, %v707_v17  ;;  %vm721_vm10 = vmor %vm719_vm9, %vm720_vm8  ;;  %v740_v32 = vand.u32 2147483648, %v503_v0  ;;  %vm734_vm13 = vweird.f32 %v503_v0 }
 0x2e4   :  { %v716_v63 = vsub.f32 1.0, %v715_v20  ;;  %v2038_v30 = vmul.f32 %v1939_v15, %v712_v51 }
 0x2e5   :  { %v741_v51 = vor.u32 1.1754944e-38, %v740_v32 }
 0x2e6   :  { %v717_v1 = vmul.f32 %v1291_v60, %v716_v63  ;;  %1177 = vmatmul.msk.f32.gmra.mxu3 %vm359_vm0, %v2038_v30  ;;  %1152 = vst.msk [vmem:[%s2403_s9 + $0x68] sm:$0xff] %vm359_vm0, %v2038_v30  ;;  %v738_v63 = vand.u32 2147483647, %v503_v0 }
 0x2e8   :  { %v718_v34 = vadd.f32 %v1291_v60, %v717_v1  ;;  %vm739_vm15 = vcmp.eq.f32.partialorder %v738_v63, 8.507059e+37  ;;  %v987_v63 = vld [vmem:[%s2399_s5 + $0xf8] sm:$0xff] }
 0x2e9   :  { %v1293_v46 = vpop.eup %1292  ;;  %1057 = vmatpush.msrb.mxu1 %v987_v63  ;;  %v961_v63 = vld [vmem:[%s2399_s5 + $0x28] sm:$0xff] }
 0x2ea   :  { %v730_v15 = vmul.f32 %v1293_v46, %v503_v0  ;;  %v458_v8 = vpop.xlane.xlu1 %457  ;;  %v722_v21 = vsel %vm721_vm10, %v1291_v60, %v718_v34  ;;  %vm735_vm12 = vweird.f32 %v1293_v46 }
 0x2eb   :  { %1294 = vrcp.f32 %v458_v8  ;;  %v727_v18 = vsel %vm724_vm11, %v726_v56, %v722_v21  ;;  %vm736_vm14 = vmor %vm734_vm13, %vm735_vm12  ;;  %v515_v56 = vand.u32 2147483648, %v458_v8  ;;  %v513_v21 = vand.u32 2147483647, %v458_v8 }
 0x2ec   :  { %v731_v2 = vsub.f32 1.0, %v730_v15  ;;  %v2048_v20 = vmul.f32 %v1954_v36, %v727_v18  ;;  %vm509_vm2 = vweird.f32 %v458_v8 }
 0x2ed   :  { %vm514_vm4 = vcmp.eq.f32.partialorder %v513_v21, 8.507059e+37 }
 0x2ee   :  { %v732_v17 = vmul.f32 %v1293_v46, %v731_v2  ;;  %1178 = vmatmul.msk.f32.gmra.mxu3 %vm359_vm0, %v2048_v20  ;;  %1153 = vst.msk [vmem:[%s2403_s9 + $0x70] sm:$0xff] %vm359_vm0, %v2048_v20 }
 0x2f0   :  { %v733_v6 = vadd.f32 %v1293_v46, %v732_v17 }
 0x2f1   :  { %v1295_v60 = vpop.eup %1294 }
 0x2f2   :  { %v505_v36 = vmul.f32 %v1295_v60, %v458_v8  ;;  %v737_v1 = vsel %vm736_vm14, %v1293_v46, %v733_v6  ;;  %vm510_vm1 = vweird.f32 %v1295_v60  ;;  %v516_v46 = vor.u32 1.1754944e-38, %v515_v56  ;;  %v971_v8 = vld [vmem:[%s2399_s5 + $0x78] sm:$0xff]  ;;  %v970_v6 = vld [vmem:[%s2399_s5 + $0x70] sm:$0xff] }
 0x2f3   :  { %v742_v25 = vsel %vm739_vm15, %v741_v51, %v737_v1  ;;  %vm511_vm3 = vmor %vm509_vm2, %vm510_vm1  ;;  %992 = vmatpush.msrb.mxu0 %v971_v8  ;;  %v968_v51 = vld [vmem:[%s2399_s5 + $0x60] sm:$0xff]  ;;  %v967_v1 = vld [vmem:[%s2399_s5 + $0x58] sm:$0xff] }
 0x2f4   :  { %v506_v10 = vsub.f32 1.0, %v505_v36  ;;  %v2058_v34 = vmul.f32 %v1972_v7, %v742_v25  ;;  %v2067_v7 = vpop.f32.mrf.mxu3  ;;  %v983_v25 = vld [vmem:[%s2399_s5 + $0xd8] sm:$0xff]  ;;  %v982_v56 = vld [vmem:[%s2399_s5 + $0xd0] sm:$0xff] }
 0x2f5   :  { %993 = vmatpush.msrb.mxu0 %v970_v6 }
 0x2f6   :  { %v507_v15 = vmul.f32 %v1295_v60, %v506_v10  ;;  %1154 = vst.msk [vmem:[%s2403_s9 + $0x78] sm:$0xff] %vm359_vm0, %v2058_v34  ;;  %1179 = vmatmul.msk.f32.gmra.mxu3 %vm359_vm0, %v2058_v34 }
 0x2f8   :  { %v508_v0 = vadd.f32 %v1295_v60, %v507_v15  ;;  %v965_v15 = vld [vmem:[%s2399_s5 + $0x48] sm:$0xff] }
 0x2fa   :  { %v512_v2 = vsel %vm511_vm3, %v1295_v60, %v508_v0  ;;  %v985_v60 = vld [vmem:[%s2399_s5 + $0xe8] sm:$0xff]  ;;  %v964_v0 = vld [vmem:[%s2399_s5 + $0x40] sm:$0xff] }
 0x2fb   :  { %v517_v18 = vsel %vm514_vm4, %v516_v46, %v512_v2  ;;  %v980_v46 = vld [vmem:[%s2399_s5 + $0xc0] sm:$0xff] }
 0x2fc   :  { %v518_v32 = vmul.f32 %v1986_v9, %v517_v18  ;;  %v2076_v17 = vpop.f32.mrf.mxu3  ;;  %v979_v18 = vld [vmem:[%s2399_s5 + $0xb8] sm:$0xff] }
 0x2fe   :  { %1139 = vst.msk [vmem:[%s2403_s9] sm:$0xff] %vm359_vm0, %v518_v32  ;;  %1164 = vmatmul.msk.f32.vlgmr.msrb.gmra.mxu2 %vm359_vm0, %v518_v32  ;;  %1180 = vmatmul.msk.f32.vlgmr.msrb.gmra.mxu3 %vm359_vm0, %v518_v32  ;;  %v962_v32 = vld [vmem:[%s2399_s5 + $0x30] sm:$0xff] }
 0x304   :  { %v2083_v9 = vpop.f32.mrf.mxu3 }
 0x306   :  { %1181 = vmatmul.msk.f32.gmra.mxu3 %vm359_vm0, %v1882_v27  ;;  %v986_v27 = vld [vmem:[%s2399_s5 + $0xf0] sm:$0xff] }
 0x307   :  { %1058 = vmatpush.msrb.mxu1 %v986_v27  ;;  %v960_v27 = vld [vmem:[%s2399_s5 + $0x20] sm:$0xff] }
 0x309   :  { %1059 = vmatpush.msrb.mxu1 %v985_v60  ;;  %v959_v60 = vld [vmem:[%s2399_s5 + $0x18] sm:$0xff] }
 0x30c   :  { %v2107_v36 = vpop.f32.mrf.mxu3 }
 0x30e   :  { %1182 = vmatmul.msk.f32.gmra.mxu3 %vm359_vm0, %v1897_v16  ;;  %v969_v16 = vld [vmem:[%s2399_s5 + $0x68] sm:$0xff] }
 0x30f   :  { %994 = vmatpush.msrb.mxu0 %v969_v16  ;;  %v976_v16 = vld [vmem:[%s2399_s5 + $0xa0] sm:$0xff] }
 0x311   :  { %995 = vmatpush.msrb.mxu0 %v968_v51 }
 0x313   :  { %996 = vmatpush.msrb.mxu0 %v967_v1 }
 0x314   :  { %v2120_v10 = vpop.f32.mrf.mxu3 }
 0x316   :  { %1183 = vmatmul.msk.f32.gmra.mxu3 %vm359_vm0, %v1912_v23  ;;  %v984_v23 = vld [vmem:[%s2399_s5 + $0xe0] sm:$0xff] }
 0x317   :  { %1060 = vmatpush.msrb.mxu1 %v984_v23  ;;  %v958_v23 = vld [vmem:[%s2399_s5 + $0x10] sm:$0xff] }
 0x319   :  { %1061 = vmatpush.msrb.mxu1 %v983_v25  ;;  %v957_v25 = vld [vmem:[%s2399_s5 + $0x8] sm:$0xff] }
 0x31b   :  { %1062 = vmatpush.msrb.mxu1 %v982_v56  ;;  %v956_v56 = vld [vmem:[%s2399_s5] sm:$0xff] }
 0x31c   :  { %v2133_v21 = vpop.f32.mrf.mxu3 }
 0x31e   :  { %1184 = vmatmul.msk.f32.gmra.mxu3 %vm359_vm0, %v1927_v4  ;;  %v966_v4 = vld [vmem:[%s2399_s5 + $0x50] sm:$0xff] }
 0x31f   :  { %997 = vmatpush.msrb.mxu0 %v966_v4  ;;  %v973_v4 = vld [vmem:[%s2399_s5 + $0x88] sm:$0xff] }
 0x321   :  { %998 = vmatpush.msrb.mxu0 %v965_v15  ;;  %v972_v15 = vld [vmem:[%s2399_s5 + $0x80] sm:$0xff] }
 0x323   :  { %999 = vmatpush.msrb.mxu0 %v964_v0 }
 0x324   :  { %v2146_v2 = vpop.f32.mrf.mxu3 }
 0x326   :  { %1185 = vmatmul.msk.f32.gmra.mxu3 %vm359_vm0, %v1942_v12  ;;  %v981_v12 = vld [vmem:[%s2399_s5 + $0xc8] sm:$0xff] }
 0x327   :  { %1063 = vmatpush.msrb.mxu1 %v981_v12 }
 0x329   :  { %1064 = vmatpush.msrb.mxu1 %v980_v46 }
 0x32b   :  { %1065 = vmatpush.msrb.mxu1 %v979_v18 }
 0x32c   :  { %v2164_v8 = vpop.f32.mrf.mxu3 }
 0x32e   :  { %1186 = vmatmul.msk.f32.gmra.mxu3 %vm359_vm0, %v1957_v5  ;;  %v963_v5 = vld [vmem:[%s2399_s5 + $0x38] sm:$0xff] }
 0x32f   :  { %1000 = vmatpush.msrb.mxu0 %v963_v5 }
 0x331   :  { %1001 = vmatpush.msrb.mxu0 %v962_v32 }
 0x333   :  { %1002 = vmatpush.msrb.mxu0 %v961_v63 }
 0x335   :  { %1003 = vmatpush.msrb.mxu0 %v960_v27  ;;  %v2430_v27 = vunpack.c.l.bf16 %v1733_v26 }
 0x336   :  { %1187 = vmatmul.msk.f32.gmra.mxu3 %vm359_vm0, %v1970_v22  ;;  %v978_v22 = vld [vmem:[%s2399_s5 + $0xb0] sm:$0xff] }
 0x337   :  { %1066 = vmatpush.msrb.mxu1 %v978_v22  ;;  %1004 = vmatpush.msrb.mxu0 %v959_v60 }
 0x339   :  { %1005 = vmatpush.msrb.mxu0 %v958_v23 }
 0x33b   :  { %1006 = vmatpush.msrb.mxu0 %v957_v25  ;;  %v2434_v25 = vunpack.c.l.bf16 %v1541_v38 }
 0x33d   :  { %1007 = vmatpush.msrb.mxu0 %v956_v56 }
 0x33e   :  { %1188 = vmatmul.msk.f32.gmra.mxu3 %vm359_vm0, %v1984_v24  ;;  %v977_v24 = vld [vmem:[%s2399_s5 + $0xa8] sm:$0xff] }
 0x33f   :  { %1067 = vmatpush.msrb.mxu1 %v977_v24 }
 0x341   :  { %1068 = vmatpush.msrb.mxu1 %v976_v16 }
 0x346   :  { %1189 = vmatmul.msk.f32.gmra.mxu3 %vm359_vm0, %v1998_v29  ;;  %v975_v29 = vld [vmem:[%s2399_s5 + $0x98] sm:$0xff] }
 0x347   :  { %1069 = vmatpush.msrb.mxu1 %v975_v29  ;;  %v2432_v29 = vunpack.c.l.bf16 %v1516_v31 }
 0x349   :  { %v2174_v6 = vpop.f32.mrf.mxu3 }
 0x34e   :  { %1190 = vmatmul.msk.f32.gmra.mxu3 %vm359_vm0, %v2008_v13  ;;  %v974_v13 = vld [vmem:[%s2399_s5 + $0x90] sm:$0xff] }
 0x34f   :  { %1070 = vmatpush.msrb.mxu1 %v974_v13 }
 0x351   :  { %v2190_v51 = vpop.f32.mrf.mxu3  ;;  %1071 = vmatpush.msrb.mxu1 %v973_v4 }
 0x353   :  { %1072 = vmatpush.msrb.mxu1 %v972_v15  ;;  %v2436_v15 = vunpack.c.l.bf16 %v1564_v43 }
 0x356   :  { %1191 = vmatmul.msk.f32.gmra.mxu3 %vm359_vm0, %v2018_v41 }
 0x359   :  { %v2200_v1 = vpop.f32.mrf.mxu3 }
 0x35e   :  { %1192 = vmatmul.msk.f32.gmra.mxu3 %vm359_vm0, %v2028_v14 }
 0x361   :  { %v2213_v41 = vpop.f32.mrf.mxu3 }
 0x366   :  { %1193 = vmatmul.msk.f32.gmra.mxu3 %vm359_vm0, %v2038_v30 }
 0x369   :  { %v2220_v12 = vpop.f32.mrf.mxu3 }
 0x36e   :  { %1194 = vmatmul.msk.f32.gmra.mxu3 %vm359_vm0, %v2048_v20  ;;  %v926_v20 = vmul.f32 %v2067_v7, %v64_v39  ;;  %v930_v39 = vmul.f32 %v2083_v9, %v68_v49  ;;  %v934_v49 = vmul.f32 %v2120_v10, %v72_v58  ;;  %v2426_v9 = vunpack.c.l.bf16 %v1684_v11 }
 0x36f   :  { %v2431_v11 = vunpack.c.h.bf16 %v1733_v26  ;;  %v2435_v26 = vunpack.c.h.bf16 %v1541_v38  ;;  %v2439_v38 = vunpack.c.h.bf16 %v1587_v48 }
 0x371   :  { %v2224_v0 = vpop.f32.mrf.mxu3 }
 0x376   :  { %1195 = vmatmul.msk.f32.gmra.mxu3 %vm359_vm0, %v2058_v34  ;;  %vm1122_vm0 = vcmask 31744  }
 0x379   :  { %v2228_v14 = vpop.f32.mrf.mxu3 }
 0x381   :  { %v811_v46 = vpop.f32.mrf.mxu2  ;;  %v876_v18 = vpop.f32.mrf.mxu3 }
 0x382   :  { %v924_v5 = vmul.f32 %v811_v46, %v62_v33  ;;  %v925_v30 = vmul.f32 %v876_v18, %v63_v35  ;;  %v928_v33 = vmul.f32 %v2076_v17, %v66_v44  ;;  %v932_v44 = vmul.f32 %v2107_v36, %v70_v54 }
 0x383   :  { %v936_v54 = vmul.f32 %v2133_v21, %v74_v62  ;;  %v2424_v17 = vunpack.c.l.bf16 %v1658_v3  ;;  %v940_v36 = vmul.f32 %v2164_v8, %v2426_v9  ;;  %v2428_v21 = vunpack.c.l.bf16 %v1710_v19 }
 0x384   :  { %1008 = vmatmul.f32.vlgmr.msrb.gmra.mxu0 %v924_v5  ;;  %1073 = vmatmul.f32.vlgmr.msrb.gmra.mxu1 %v925_v30  ;;  %v2429_v3 = vunpack.c.h.bf16 %v1710_v19  ;;  %v944_v8 = vmul.f32 %v2190_v51, %v2430_v27  ;;  %v2433_v19 = vunpack.c.h.bf16 %v1516_v31  ;;  %v948_v51 = vmul.f32 %v2213_v41, %v2434_v25 }
 0x385   :  { %v938_v58 = vmul.f32 %v2146_v2, %v2424_v17  ;;  %v942_v63 = vmul.f32 %v2174_v6, %v2428_v21  ;;  %v946_v6 = vmul.f32 %v2200_v1, %v2432_v29  ;;  %v950_v1 = vmul.f32 %v2220_v12, %v2436_v15 }
 0x386   :  { %v2437_v31 = vunpack.c.h.bf16 %v1564_v43  ;;  %v2438_v18 = vunpack.c.l.bf16 %v1587_v48  ;;  %v2441_v43 = vunpack.c.h.bf16 %v1610_v53 }
 0x388   :  { %v952_v41 = vmul.f32 %v2224_v0, %v2438_v18  ;;  %v2312_v0 = vld [vmem:[%s2400_s6] ss:$0 sm:$0xff] }
 0x389   :  { %v879_v32 = vpop.f32.mrf.mxu3 }
 0x38a   :  { %v927_v34 = vmul.f32 %v879_v32, %v65_v40 }
 0x38c   :  { %1011 = vmatmul.f32.gmra.mxu0 %v926_v20  ;;  %1076 = vmatmul.f32.gmra.mxu1 %v927_v34  ;;  %v2440_v20 = vunpack.c.l.bf16 %v1610_v53 }
 0x38e   :  { %v954_v12 = vmul.f32 %v2228_v14, %v2440_v20 }
 0x391   :  { %v882_v22 = vpop.f32.mrf.mxu3 }
 0x392   :  { %v929_v28 = vmul.f32 %v882_v22, %v67_v45 }
 0x394   :  { %1014 = vmatmul.f32.gmra.mxu0 %v928_v33  ;;  %1079 = vmatmul.f32.gmra.mxu1 %v929_v28 }
 0x399   :  { %v885_v35 = vpop.f32.mrf.mxu3 }
 0x39a   :  { %v931_v37 = vmul.f32 %v885_v35, %v69_v50 }
 0x39c   :  { %1017 = vmatmul.f32.gmra.mxu0 %v930_v39  ;;  %1082 = vmatmul.f32.gmra.mxu1 %v931_v37 }
 0x3a1   :  { %v888_v40 = vpop.f32.mrf.mxu3 }
 0x3a2   :  { %v933_v42 = vmul.f32 %v888_v40, %v71_v55 }
 0x3a4   :  { %1020 = vmatmul.f32.gmra.mxu0 %v932_v44  ;;  %1085 = vmatmul.f32.gmra.mxu1 %v933_v42 }
 0x3a9   :  { %v891_v45 = vpop.f32.mrf.mxu3 }
 0x3aa   :  { %v935_v47 = vmul.f32 %v891_v45, %v73_v59 }
 0x3ac   :  { %1023 = vmatmul.f32.gmra.mxu0 %v934_v49  ;;  %1088 = vmatmul.f32.gmra.mxu1 %v935_v47 }
 0x3b1   :  { %v894_v50 = vpop.f32.mrf.mxu3 }
 0x3b2   :  { %v937_v55 = vmul.f32 %v894_v50, %v2423_v52 }
 0x3b4   :  { %1026 = vmatmul.f32.gmra.mxu0 %v936_v54  ;;  %1091 = vmatmul.f32.gmra.mxu1 %v937_v55 }
 0x3b9   :  { %v897_v7 = vpop.f32.mrf.mxu3 }
 0x3ba   :  { %v939_v59 = vmul.f32 %v897_v7, %v2425_v57 }
 0x3bc   :  { %1029 = vmatmul.f32.gmra.mxu0 %v938_v58  ;;  %1094 = vmatmul.f32.gmra.mxu1 %v939_v59 }
 0x3c1   :  { %v900_v62 = vpop.f32.mrf.mxu3 }
 0x3c2   :  { %v941_v10 = vmul.f32 %v900_v62, %v2427_v61 }
 0x3c4   :  { %1032 = vmatmul.f32.gmra.mxu0 %v940_v36  ;;  %1097 = vmatmul.f32.gmra.mxu1 %v941_v10 }
 0x3c9   :  { %v903_v2 = vpop.f32.mrf.mxu3 }
 0x3ca   :  { %v943_v24 = vmul.f32 %v903_v2, %v2429_v3 }
 0x3cc   :  { %1035 = vmatmul.f32.gmra.mxu0 %v942_v63  ;;  %1100 = vmatmul.f32.gmra.mxu1 %v943_v24 }
 0x3d1   :  { %v906_v16 = vpop.f32.mrf.mxu3 }
 0x3d2   :  { %v945_v60 = vmul.f32 %v906_v16, %v2431_v11 }
 0x3d4   :  { %1038 = vmatmul.f32.gmra.mxu0 %v944_v8  ;;  %1103 = vmatmul.f32.gmra.mxu1 %v945_v60 }
 0x3d9   :  { %v909_v23 = vpop.f32.mrf.mxu3 }
 0x3da   :  { %v947_v13 = vmul.f32 %v909_v23, %v2433_v19 }
 0x3dc   :  { %1041 = vmatmul.f32.gmra.mxu0 %v946_v6  ;;  %1106 = vmatmul.f32.gmra.mxu1 %v947_v13 }
 0x3e1   :  { %v912_v4 = vpop.f32.mrf.mxu3 }
 0x3e2   :  { %v949_v56 = vmul.f32 %v912_v4, %v2435_v26 }
 0x3e4   :  { %1044 = vmatmul.f32.gmra.mxu0 %v948_v51  ;;  %1109 = vmatmul.f32.gmra.mxu1 %v949_v56 }
 0x3e9   :  { %v915_v46 = vpop.f32.mrf.mxu3 }
 0x3ea   :  { %v951_v5 = vmul.f32 %v915_v46, %v2437_v31 }
 0x3ec   :  { %1047 = vmatmul.f32.gmra.mxu0 %v950_v1  ;;  %1112 = vmatmul.f32.gmra.mxu1 %v951_v5 }
 0x3f1   :  { %v918_v30 = vpop.f32.mrf.mxu3 }
 0x3f2   :  { %v953_v32 = vmul.f32 %v918_v30, %v2439_v38 }
 0x3f4   :  { %1050 = vmatmul.f32.gmra.mxu0 %v952_v41  ;;  %1115 = vmatmul.f32.gmra.mxu1 %v953_v32 }
 0x3f9   :  { %v921_v34 = vpop.f32.mrf.mxu3 }
 0x3fa   :  { %v955_v22 = vmul.f32 %v921_v34, %v2441_v43 }
 0x3fc   :  { %1053 = vmatmul.f32.gmra.mxu0 %v954_v12  ;;  %1118 = vmatmul.f32.gmra.mxu1 %v955_v22 }
 0x401   :  { %v1009_v33 = vpop.f32.mrf.mxu0  ;;  %v1074_v28 = vpop.f32.mrf.mxu1 }
 0x402   :  { %v1010_v48 = vadd.f32 %v2312_v0, %v1009_v33 }
 0x404   :  { %v1075_v35 = vadd.f32 %v1074_v28, %v1010_v48 }
 0x406   :  { %1123 = vst.msk [vmem:[%s2402_s8] sm:$0xff] %vm1122_vm0, %v1075_v35 }
 0x409   :  { %v1012_v53 = vpop.f32.mrf.mxu0  ;;  %v1077_v39 = vpop.f32.mrf.mxu1 }
 0x40a   :  { %v1013_v14 = vadd.f32 %v2312_v0, %v1012_v53 }
 0x40c   :  { %v1078_v37 = vadd.f32 %v1077_v39, %v1013_v14 }
 0x40e   :  { %1124 = vst.msk [vmem:[%s2402_s8 + $0x8] sm:$0xff] %vm1122_vm0, %v1078_v37 }
 0x411   :  { %v1015_v40 = vpop.f32.mrf.mxu0  ;;  %v1080_v42 = vpop.f32.mrf.mxu1 }
 0x412   :  { %v1016_v44 = vadd.f32 %v2312_v0, %v1015_v40 }
 0x414   :  { %v1081_v45 = vadd.f32 %v1080_v42, %v1016_v44 }
 0x416   :  { %1125 = vst.msk [vmem:[%s2402_s8 + $0x10] sm:$0xff] %vm1122_vm0, %v1081_v45 }
 0x419   :  { %v1018_v49 = vpop.f32.mrf.mxu0  ;;  %v1083_v50 = vpop.f32.mrf.mxu1 }
 0x41a   :  { %v1019_v47 = vadd.f32 %v2312_v0, %v1018_v49 }
 0x41c   :  { %v1084_v54 = vadd.f32 %v1083_v50, %v1019_v47 }
 0x41e   :  { %1126 = vst.msk [vmem:[%s2402_s8 + $0x18] sm:$0xff] %vm1122_vm0, %v1084_v54 }
 0x421   :  { %v1021_v52 = vpop.f32.mrf.mxu0  ;;  %v1086_v7 = vpop.f32.mrf.mxu1 }
 0x422   :  { %v1022_v55 = vadd.f32 %v2312_v0, %v1021_v52 }
 0x424   :  { %v1087_v17 = vadd.f32 %v1086_v7, %v1022_v55 }
 0x426   :  { %1127 = vst.msk [vmem:[%s2402_s8 + $0x20] sm:$0xff] %vm1122_vm0, %v1087_v17 }
 0x429   :  { %v1024_v58 = vpop.f32.mrf.mxu0  ;;  %v1089_v59 = vpop.f32.mrf.mxu1 }
 0x42a   :  { %v1025_v57 = vadd.f32 %v2312_v0, %v1024_v58 }
 0x42c   :  { %v1090_v9 = vadd.f32 %v1089_v59, %v1025_v57 }
 0x42e   :  { %1128 = vst.msk [vmem:[%s2402_s8 + $0x28] sm:$0xff] %vm1122_vm0, %v1090_v9 }
 0x431   :  { %v1027_v36 = vpop.f32.mrf.mxu0  ;;  %v1092_v61 = vpop.f32.mrf.mxu1 }
 0x432   :  { %v1028_v62 = vadd.f32 %v2312_v0, %v1027_v36 }
 0x434   :  { %v1093_v10 = vadd.f32 %v1092_v61, %v1028_v62 }
 0x436   :  { %1129 = vst.msk [vmem:[%s2402_s8 + $0x30] sm:$0xff] %vm1122_vm0, %v1093_v10 }
 0x439   :  { %v1030_v21 = vpop.f32.mrf.mxu0  ;;  %v1095_v2 = vpop.f32.mrf.mxu1 }
 0x43a   :  { %v1031_v63 = vadd.f32 %v2312_v0, %v1030_v21 }
 0x43c   :  { %v1096_v3 = vadd.f32 %v1095_v2, %v1031_v63 }
 0x43e   :  { %1130 = vst.msk [vmem:[%s2402_s8 + $0x38] sm:$0xff] %vm1122_vm0, %v1096_v3 }
 0x441   :  { %v1033_v24 = vpop.f32.mrf.mxu0  ;;  %v1098_v8 = vpop.f32.mrf.mxu1 }
 0x442   :  { %v1034_v27 = vadd.f32 %v2312_v0, %v1033_v24 }
 0x444   :  { %v1099_v16 = vadd.f32 %v1098_v8, %v1034_v27 }
 0x446   :  { %1131 = vst.msk [vmem:[%s2402_s8 + $0x40] sm:$0xff] %vm1122_vm0, %v1099_v16 }
 0x449   :  { %v1036_v11 = vpop.f32.mrf.mxu0  ;;  %v1101_v29 = vpop.f32.mrf.mxu1 }
 0x44a   :  { %v1037_v60 = vadd.f32 %v2312_v0, %v1036_v11 }
 0x44c   :  { %v1102_v6 = vadd.f32 %v1101_v29, %v1037_v60 }
 0x44e   :  { %1132 = vst.msk [vmem:[%s2402_s8 + $0x48] sm:$0xff] %vm1122_vm0, %v1102_v6 }
 0x451   :  { %v1039_v23 = vpop.f32.mrf.mxu0  ;;  %v1104_v13 = vpop.f32.mrf.mxu1 }
 0x452   :  { %v1040_v19 = vadd.f32 %v2312_v0, %v1039_v23 }
 0x454   :  { %v1105_v25 = vadd.f32 %v1104_v13, %v1040_v19 }
 0x456   :  { %1133 = vst.msk [vmem:[%s2402_s8 + $0x50] sm:$0xff] %vm1122_vm0, %v1105_v25 }
 0x459   :  { %v1042_v51 = vpop.f32.mrf.mxu0  ;;  %v1107_v26 = vpop.f32.mrf.mxu1 }
 0x45a   :  { %v1043_v4 = vadd.f32 %v2312_v0, %v1042_v51 }
 0x45c   :  { %v1108_v56 = vadd.f32 %v1107_v26, %v1043_v4 }
 0x45e   :  { %1134 = vst.msk [vmem:[%s2402_s8 + $0x58] sm:$0xff] %vm1122_vm0, %v1108_v56 }
 0x461   :  { %v1045_v15 = vpop.f32.mrf.mxu0  ;;  %v1110_v46 = vpop.f32.mrf.mxu1 }
 0x462   :  { %v1046_v1 = vadd.f32 %v2312_v0, %v1045_v15 }
 0x464   :  { %v1111_v31 = vadd.f32 %v1110_v46, %v1046_v1 }
 0x466   :  { %1135 = vst.msk [vmem:[%s2402_s8 + $0x60] sm:$0xff] %vm1122_vm0, %v1111_v31 }
 0x469   :  { %v1048_v5 = vpop.f32.mrf.mxu0  ;;  %v1113_v41 = vpop.f32.mrf.mxu1 }
 0x46a   :  { %v1049_v18 = vadd.f32 %v2312_v0, %v1048_v5 }
 0x46c   :  { %v1114_v30 = vadd.f32 %v1113_v41, %v1049_v18 }
 0x46e   :  { %1136 = vst.msk [vmem:[%s2402_s8 + $0x68] sm:$0xff] %vm1122_vm0, %v1114_v30 }
 0x471   :  { %v1051_v38 = vpop.f32.mrf.mxu0  ;;  %v1116_v20 = vpop.f32.mrf.mxu1 }
 0x472   :  { %v1052_v32 = vadd.f32 %v2312_v0, %v1051_v38 }
 0x474   :  { %v1117_v12 = vadd.f32 %v1116_v20, %v1052_v32 }
 0x476   :  { %1137 = vst.msk [vmem:[%s2402_s8 + $0x70] sm:$0xff] %vm1122_vm0, %v1117_v12 }
 0x479   :  { %v1054_v34 = vpop.f32.mrf.mxu0  ;;  %v1119_v22 = vpop.f32.mrf.mxu1 }
 0x47a   :  { %v1055_v43 = vadd.f32 %v2312_v0, %v1054_v34 }
 0x47c   :  { %v1120_v33 = vadd.f32 %v1119_v22, %v1055_v43 }
 0x47e   :  { %1138 = vst.msk [vmem:[%s2402_s8 + $0x78] sm:$0xff] %vm1122_vm0, %v1120_v33 }
 0x47f   :  { %1163 = vsyncpa [#allocation4], 1 }

</bundles_post_ra>
